<compile_context>
chip_gen: v7x
topology: tpu7x:2x2x1
jax: 0.10.0
libtpu: 0.0.40
codegen_flags: <defaults>
</compile_context>

<pallas_src>
import functools

import jax
import jax.numpy as jnp
from jax.experimental import pallas as pl
from jax.experimental.pallas import tpu as pltpu


def _pairwise_head_kernel(xi_ref, xj_ref, sqi_ref, sqj_ref, yrow_ref, ycol_ref,
                          out_ref, dist_acc, loss_acc,
                          *, metric, B, sub_r, sub_c, epi_rows):
    j = pl.program_id(1)
    f = pl.program_id(2)
    nj = pl.num_programs(1)
    nf = pl.num_programs(2)

    bi, bj = dist_acc.shape
    bf = xi_ref.shape[1]

    # ---- per-i-block loss accumulator: reset at the first (j, f) step ----
    @pl.when(jnp.logical_and(j == 0, f == 0))
    def _():
        loss_acc[...] = jnp.zeros_like(loss_acc)

    # ---- pairwise accumulator: reset at the first f step of each (i, j) tile ----
    @pl.when(f == 0)
    def _():
        dist_acc[...] = jnp.zeros_like(dist_acc)

    if metric == "euclidean":
        # Raw Gram matrix on the MXU in the streamed (bf16) dtype, f32 accumulation.
        # Norms |xi|^2, |xj|^2 are precomputed in the wrapper and added in the epilogue.
        dist_acc[...] += jax.lax.dot_general(
            xi_ref[...], xj_ref[...], (((1,), (1,)), ((), ())),
            preferred_element_type=jnp.float32)
    elif metric == "manhattan":
        # Bounded-broadcast row groups, accumulated straight into VMEM (no loop carry).
        grp = bi
        while grp > 1 and grp * bj * bf > 32768:      # keep |rows - xj| within ~32 vregs
            grp //= 2
        while bi % grp:
            grp -= 1
        xj = xj_ref[...].astype(jnp.float32)
        for g in range(bi // grp):                    # static loop, static slices
            r0 = g * grp
            rows = xi_ref[pl.ds(r0, grp), :].astype(jnp.float32)          # (grp, bf)
            d = jnp.sum(jnp.abs(rows[:, None, :] - xj[None, :, :]), axis=-1)
            dist_acc[pl.ds(r0, grp), :] += d
    else:
        raise ValueError("not implemented")

    # ---- loss contribution once the feature reduction of this (i, j) tile is done ----
    @pl.when(f == nf - 1)
    def _():
        yrow = yrow_ref[...]                          # (1, bj)  int32
        sq_j = sqj_ref[...]                           # (1, bj)  f32 (unused for manhattan)
        for r0 in range(0, bi, epi_rows):             # row chunks bound register pressure
            rows = pl.ds(r0, epi_rows)
            if metric == "euclidean":
                # dist = |xi|^2 + |xj|^2 - 2*gram; clamp tiny negative cancellation.
                d = jnp.maximum(sqi_ref[rows, :] + sq_j - 2.0 * dist_acc[rows, :], 0.0)
            else:
                d = dist_acc[rows, :]
            neq = (ycol_ref[rows, :] != yrow).astype(jnp.float32)
            # -neq*log(1.01-exp(-d)) - eq*log(exp(-d))  ==  eq*d - neq*log(1.01-exp(-d))
            contrib = (1.0 - neq) * d - neq * jnp.log(1.01 - jnp.exp(-d))
            # Fold (epi_rows, bj) -> (sub_r, sub_c) with vreg-aligned adds (no XLU).
            fold = None
            for a in range(epi_rows // sub_r):
                for b in range(bj // sub_c):
                    blk = contrib[a * sub_r:(a + 1) * sub_r, b * sub_c:(b + 1) * sub_c]
                    fold = blk if fold is None else fold + blk
            loss_acc[...] += fold

    # ---- finalize this i block's partial loss on the last (j, f) step ----
    @pl.when(jnp.logical_and(j == nj - 1, f == nf - 1))
    def _():
        partial = jnp.sum(loss_acc[...], keepdims=True) * (1.0 / float(B * B))   # (1, 1)
        out_ref[...] = jnp.broadcast_to(partial, out_ref.shape)


def _pick_block(n, target, align):
    """Largest multiple of `align` that divides n and is <= target, else n (full dim)."""
    if n <= target:
        return n
    t = (target // align) * align
    while t >= align:
        if n % t == 0:
            return t
        t -= align
    return n


def pairwise_head(X, y, *, metric="euclidean", regularize=0.01,
                  block_i=None, block_j=None, block_f=None,
                  gram_dtype=jnp.bfloat16):
    """X: (B, F) float, y: (B,) int labels. Returns the scalar f32 loss."""
    if metric not in ("euclidean", "manhattan"):
        raise ValueError("not implemented")
    B, F = X.shape
    Xf = X.astype(jnp.float32)

    if metric == "euclidean":
        if block_i is None:
            # Cap at B//2 so the "parallel" i axis has >= 2 blocks (v7x's 2nd TensorCore).
            block_i = _pick_block(B, min(512, max(B // 2, 8)), 8)
        if block_j is None:
            block_j = _pick_block(B, 512, 128)
        if block_f is None:
            block_f = F if F <= 2048 else _pick_block(F, 512, 128)   # nf==1 when it fits
        Xk = X.astype(gram_dtype)                                     # bf16 gram on the MXU
    else:
        if block_i is None:
            block_i = _pick_block(B, 128, 8)
        if block_j is None:
            block_j = _pick_block(B, 128, 128)
        if block_f is None:
            block_f = _pick_block(F, 128, 128)
        Xk = Xf                                                       # VPU path stays f32
    assert B % block_i == 0 and B % block_j == 0 and F % block_f == 0

    nbi, nbj, nbf = B // block_i, B // block_j, F // block_f

    # Precomputed once in XLA (O(B*F)) instead of every grid step inside the kernel.
    row_sq = jnp.sum(Xf * Xf, axis=1)
    sq_col = row_sq.reshape(B, 1)
    sq_row = row_sq.reshape(1, B)
    reg_term = jnp.float32(regularize) * jnp.mean(Xf * Xf)

    y = y.astype(jnp.int32)
    y_row = y.reshape(1, B)
    y_col = y.reshape(B, 1)

    # vreg-aligned loss-partial accumulator shape and epilogue row-chunking.
    sub_r = 8 if block_i % 8 == 0 else block_i
    sub_c = 128 if block_j % 128 == 0 else block_j
    epi_rows = block_i
    if sub_r == 8:
        epi_rows = min(block_i, max(8, (32768 // block_j) // 8 * 8))
        while block_i % epi_rows:
            epi_rows -= 8

    kernel = functools.partial(_pairwise_head_kernel, metric=metric, B=B,
                               sub_r=sub_r, sub_c=sub_c, epi_rows=epi_rows)

    # Raise the scoped-VMEM limit only when the footprint would exceed v5e's 16 MiB default.
    itemsize = jnp.dtype(Xk.dtype).itemsize
    vmem_est = (2 * (block_i + block_j) * block_f * itemsize       # double-buffered X tiles
                + block_i * block_j * 4                            # distance accumulator
                + sub_r * sub_c * 4                                # loss-partial accumulator
                + 4 * (block_i + block_j) * 4)                     # norms + labels
    vmem_limit = None
    if vmem_est > (12 << 20):
        vmem_limit = int(min(2 * vmem_est + (4 << 20), 48 << 20))

    out = pl.pallas_call(
        kernel,
        out_shape=jax.ShapeDtypeStruct((1, nbi * 128), jnp.float32),
        grid=(nbi, nbj, nbf),
        in_specs=[
            pl.BlockSpec((block_i, block_f), lambda i, j, f: (i, f)),   # X, row (i) tile
            pl.BlockSpec((block_j, block_f), lambda i, j, f: (j, f)),   # X, col (j) tile
            pl.BlockSpec((block_i, 1), lambda i, j, f: (i, 0)),         # |x_i|^2 column
            pl.BlockSpec((1, block_j), lambda i, j, f: (0, j)),         # |x_j|^2 row
            pl.BlockSpec((1, block_j), lambda i, j, f: (0, j)),         # y as a row
            pl.BlockSpec((block_i, 1), lambda i, j, f: (i, 0)),         # y as a column
        ],
        out_specs=pl.BlockSpec((1, 128), lambda i, j, f: (0, i)),       # lane-dense partials
        scratch_shapes=[
            pltpu.VMEM((block_i, block_j), jnp.float32),   # gram / L1 distance accumulator
            pltpu.VMEM((sub_r, sub_c), jnp.float32),       # vreg-aligned loss partials
        ],
        compiler_params=pltpu.CompilerParams(
            dimension_semantics=("parallel", "arbitrary", "arbitrary"),
            vmem_limit_bytes=vmem_limit),
    )(Xk, Xk, sq_col, sq_row, y_row, y_col)

    # Lane 0 of each (1, 128) output block holds that i block's partial loss.
    return jnp.sum(out.reshape(nbi, 128)[:, 0]) + reg_term


def _reference(X, y, metric="euclidean", regularize=0.01):
    """Pure-JAX reference (robust form: log(exp(-d)) == -d, identical in math)."""
    X = X.astype(jnp.float32)
    avg_dist = jnp.mean(X ** 2)
    diff = X[None, :, :] - X[:, None, :]
    if metric == "euclidean":
        dist = jnp.sum(diff ** 2, axis=-1)
    else:
        dist = jnp.sum(jnp.abs(diff), axis=-1)
    neq = (y[None, :] != y[:, None]).astype(jnp.float32)
    eq = 1.0 - neq
    loss = -jnp.mean(neq * jnp.log(1.01 - jnp.exp(-dist))) + jnp.mean(eq * dist)
    return loss + regularize * avg_dist


if __name__ == "__main__":
    key = jax.random.PRNGKey(0)
    kx, ky = jax.random.split(key)

    # Euclidean, default tiling: B=256, F=256 -> block_i=128 (2 parallel i blocks),
    # block_j=256, block_f=F (single feature chunk), bf16 gram.
    B, F = 256, 256
    X = 0.1 * jax.random.normal(kx, (B, F), dtype=jnp.float32)
    y = jax.random.randint(ky, (B,), 0, 4, dtype=jnp.int32)

    loss = jax.block_until_ready(pairwise_head(X, y, metric="euclidean", regularize=0.01))
    ref = _reference(X, y, metric="euclidean", regularize=0.01)
    assert jnp.allclose(loss, ref, rtol=1e-3, atol=1e-3), (loss, ref)

    # Euclidean, explicit 128-tiles -> grid (2, 2, 2) exercises j- and f-axis accumulation.
    loss_t = jax.block_until_ready(
        pairwise_head(X, y, metric="euclidean", regularize=0.01,
                      block_i=128, block_j=128, block_f=128))
    assert jnp.allclose(loss_t, ref, rtol=1e-3, atol=1e-3), (loss_t, ref)

    # Manhattan: small single-tile case (VPU path, f32).
    k1, k2 = jax.random.split(ky)
    B2, F2 = 64, 128
    X2 = 0.1 * jax.random.normal(k1, (B2, F2), dtype=jnp.float32)
    y2 = jax.random.randint(k2, (B2,), 0, 3, dtype=jnp.int32)
    loss2 = jax.block_until_ready(
        pairwise_head(X2, y2, metric="manhattan", regularize=0.01))
    ref2 = _reference(X2, y2, metric="manhattan", regularize=0.01)
    assert jnp.allclose(loss2, ref2, rtol=1e-3, atol=1e-3), (loss2, ref2)

    print("KERNEL_OK")
</pallas_src>

<mosaic_0001>
module attributes {stable_mosaic.version = 11 : i64} {
  func.func @_pairwise_head_kernel(%arg0: i32, %arg1: i32, %arg2: i32, %arg3: memref<128x256xbf16, #tpu.memory_space<vmem>>, %arg4: memref<256x256xbf16, #tpu.memory_space<vmem>>, %arg5: memref<128x1xf32, #tpu.memory_space<vmem>>, %arg6: memref<1x256xf32, #tpu.memory_space<vmem>>, %arg7: memref<1x256xi32, #tpu.memory_space<vmem>>, %arg8: memref<128x1xi32, #tpu.memory_space<vmem>>, %arg9: memref<1x128xf32, #tpu.memory_space<vmem>>, %arg10: memref<128x256xf32, #tpu.memory_space<vmem>>, %arg11: memref<8x128xf32, #tpu.memory_space<vmem>>) attributes {dimension_semantics = [#tpu.dimension_semantics<parallel>, #tpu.dimension_semantics<arbitrary>, #tpu.dimension_semantics<arbitrary>], iteration_bounds = array<i64: 2, 1, 1>, scalar_prefetch = 0 : i64, scratch_operands = 2 : i64, tpu.core_type = #tpu.core_type<tc>, window_params = [{transform_indices = @transform_0, window_bounds = array<i64: 128, 256>}, {transform_indices = @transform_1, window_bounds = array<i64: 256, 256>}, {transform_indices = @transform_2, window_bounds = array<i64: 128, 1>}, {transform_indices = @transform_3, window_bounds = array<i64: 1, 256>}, {transform_indices = @transform_4, window_bounds = array<i64: 1, 256>}, {transform_indices = @transform_5, window_bounds = array<i64: 128, 1>}, {transform_indices = @transform_6, window_bounds = array<i64: 1, 128>}]} {
    %c0_i32 = arith.constant 0 : i32
    %0 = arith.cmpi eq, %arg1, %c0_i32 : i32
    %c0_i32_0 = arith.constant 0 : i32
    %1 = arith.cmpi eq, %arg2, %c0_i32_0 : i32
    %2 = arith.andi %0, %1 : i1
    %3 = arith.extui %2 : i1 to i32
    %c0_i32_1 = arith.constant 0 : i32
    %4 = arith.cmpi ne, %3, %c0_i32_1 : i32
    scf.if %4 {
      %cst_16 = arith.constant 0.000000e+00 : f32
      %22 = vector.broadcast %cst_16 : f32 to vector<8x128xf32>
      %c0_17 = arith.constant 0 : index
      %c0_18 = arith.constant 0 : index
      %23 = vector.load %arg11[%c0_17, %c0_18] : memref<8x128xf32, #tpu.memory_space<vmem>>, vector<8x128xf32>
      tpu.vector_store %arg11[%c0_17, %c0_18], %22 {strides = array<i32>} : memref<8x128xf32, #tpu.memory_space<vmem>>, vector<8x128xf32>,
    } else {
    }
    %c0_i32_2 = arith.constant 0 : i32
    %5 = arith.cmpi eq, %arg2, %c0_i32_2 : i32
    %6 = arith.extui %5 : i1 to i32
    %c0_i32_3 = arith.constant 0 : i32
    %7 = arith.cmpi ne, %6, %c0_i32_3 : i32
    scf.if %7 {
      %cst_16 = arith.constant 0.000000e+00 : f32
      %22 = vector.broadcast %cst_16 : f32 to vector<128x256xf32>
      %c0_17 = arith.constant 0 : index
      %c0_18 = arith.constant 0 : index
      %23 = vector.load %arg10[%c0_17, %c0_18] : memref<128x256xf32, #tpu.memory_space<vmem>>, vector<128x256xf32>
      tpu.vector_store %arg10[%c0_17, %c0_18], %22 {strides = array<i32>} : memref<128x256xf32, #tpu.memory_space<vmem>>, vector<128x256xf32>,
    } else {
    }
    %c0 = arith.constant 0 : index
    %c0_4 = arith.constant 0 : index
    %8 = vector.load %arg10[%c0, %c0_4] : memref<128x256xf32, #tpu.memory_space<vmem>>, vector<128x256xf32>
    %c0_5 = arith.constant 0 : index
    %c0_6 = arith.constant 0 : index
    %9 = vector.load %arg3[%c0_5, %c0_6] : memref<128x256xbf16, #tpu.memory_space<vmem>>, vector<128x256xbf16>
    %c0_7 = arith.constant 0 : index
    %c0_8 = arith.constant 0 : index
    %10 = vector.load %arg4[%c0_7, %c0_8] : memref<256x256xbf16, #tpu.memory_space<vmem>>, vector<256x256xbf16>
    %cst = arith.constant dense<0.000000e+00> : vector<128x256xf32>
    %11 = tpu.matmul %9, %10, %cst {dimension_numbers = #tpu.dot_dimension_numbers<[1], [1], [0], [0], [0, 0, 1, 0], [], []>} : vector<128x256xbf16>, vector<256x256xbf16>, vector<128x256xf32> -> vector<128x256xf32>
    %12 = arith.addf %8, %11 : vector<128x256xf32>
    %c0_9 = arith.constant 0 : index
    %c0_10 = arith.constant 0 : index
    %13 = vector.load %arg10[%c0_9, %c0_10] : memref<128x256xf32, #tpu.memory_space<vmem>>, vector<128x256xf32>
    tpu.vector_store %arg10[%c0_9, %c0_10], %12 {strides = array<i32>} : memref<128x256xf32, #tpu.memory_space<vmem>>, vector<128x256xf32>,
    %c0_i32_11 = arith.constant 0 : i32
    %14 = arith.cmpi eq, %arg2, %c0_i32_11 : i32
    %15 = arith.extui %14 : i1 to i32
    %c0_i32_12 = arith.constant 0 : i32
    %16 = arith.cmpi ne, %15, %c0_i32_12 : i32
    scf.if %16 {
      %c0_16 = arith.constant 0 : index
      %c0_17 = arith.constant 0 : index
      %22 = vector.load %arg7[%c0_16, %c0_17] : memref<1x256xi32, #tpu.memory_space<vmem>>, vector<1x256xi32>
      %c0_18 = arith.constant 0 : index
      %c0_19 = arith.constant 0 : index
      %23 = vector.load %arg6[%c0_18, %c0_19] : memref<1x256xf32, #tpu.memory_space<vmem>>, vector<1x256xf32>
      %c0_20 = arith.constant 0 : index
      %c0_21 = arith.constant 0 : index
      %24 = vector.load %arg5[%c0_20, %c0_21] : memref<128x1xf32, #tpu.memory_space<vmem>>, vector<128x1xf32>
      %25 = vector.broadcast %24 : vector<128x1xf32> to vector<128x256xf32>
      %26 = vector.broadcast %23 : vector<1x256xf32> to vector<128x256xf32>
      %27 = arith.addf %25, %26 : vector<128x256xf32>
      %c0_22 = arith.constant 0 : index
      %c0_23 = arith.constant 0 : index
      %28 = vector.load %arg10[%c0_22, %c0_23] : memref<128x256xf32, #tpu.memory_space<vmem>>, vector<128x256xf32>
      %cst_24 = arith.constant 2.000000e+00 : f32
      %29 = vector.broadcast %cst_24 : f32 to vector<128x256xf32>
      %30 = arith.mulf %29, %28 : vector<128x256xf32>
      %31 = arith.subf %27, %30 : vector<128x256xf32>
      %cst_25 = arith.constant 0.000000e+00 : f32
      %32 = vector.broadcast %cst_25 : f32 to vector<128x256xf32>
      %33 = arith.maximumf %31, %32 : vector<128x256xf32>
      %c0_26 = arith.constant 0 : index
      %c0_27 = arith.constant 0 : index
      %34 = vector.load %arg8[%c0_26, %c0_27] : memref<128x1xi32, #tpu.memory_space<vmem>>, vector<128x1xi32>
      %35 = vector.broadcast %34 : vector<128x1xi32> to vector<128x256xi32>
      %36 = vector.broadcast %22 : vector<1x256xi32> to vector<128x256xi32>
      %37 = arith.cmpi ne, %35, %36 : vector<128x256xi32>
      %38 = arith.extui %37 : vector<128x256xi1> to vector<128x256xi32>
      %39 = arith.sitofp %38 : vector<128x256xi32> to vector<128x256xf32>
      %cst_28 = arith.constant 1.000000e+00 : f32
      %40 = vector.broadcast %cst_28 : f32 to vector<128x256xf32>
      %41 = arith.subf %40, %39 : vector<128x256xf32>
      %42 = arith.mulf %41, %33 : vector<128x256xf32>
      %cst_29 = arith.constant 0.000000e+00 : f32
      %43 = vector.broadcast %cst_29 : f32 to vector<128x256xf32>
      %44 = arith.subf %43, %33 : vector<128x256xf32>
      %45 = math.exp %44 : vector<128x256xf32>
      %cst_30 = arith.constant 1.010000e+00 : f32
      %46 = vector.broadcast %cst_30 : f32 to vector<128x256xf32>
      %47 = arith.subf %46, %45 : vector<128x256xf32>
      %48 = math.log %47 : vector<128x256xf32>
      %49 = arith.mulf %39, %48 : vector<128x256xf32>
      %50 = arith.subf %42, %49 : vector<128x256xf32>
      %51 = vector.extract_strided_slice %50 {offsets = [0, 0], sizes = [8, 128], strides = [1, 1]} : vector<128x256xf32> to vector<8x128xf32>
      %52 = vector.extract_strided_slice %50 {offsets = [0, 128], sizes = [8, 128], strides = [1, 1]} : vector<128x256xf32> to vector<8x128xf32>
      %53 = arith.addf %51, %52 : vector<8x128xf32>
      %54 = vector.extract_strided_slice %50 {offsets = [8, 0], sizes = [8, 128], strides = [1, 1]} : vector<128x256xf32> to vector<8x128xf32>
      %55 = arith.addf %53, %54 : vector<8x128xf32>
      %56 = vector.extract_strided_slice %50 {offsets = [8, 128], sizes = [8, 128], strides = [1, 1]} : vector<128x256xf32> to vector<8x128xf32>
      %57 = arith.addf %55, %56 : vector<8x128xf32>
      %58 = vector.extract_strided_slice %50 {offsets = [16, 0], sizes = [8, 128], strides = [1, 1]} : vector<128x256xf32> to vector<8x128xf32>
      %59 = arith.addf %57, %58 : vector<8x128xf32>
      %60 = vector.extract_strided_slice %50 {offsets = [16, 128], sizes = [8, 128], strides = [1, 1]} : vector<128x256xf32> to vector<8x128xf32>
      %61 = arith.addf %59, %60 : vector<8x128xf32>
      %62 = vector.extract_strided_slice %50 {offsets = [24, 0], sizes = [8, 128], strides = [1, 1]} : vector<128x256xf32> to vector<8x128xf32>
      %63 = arith.addf %61, %62 : vector<8x128xf32>
      %64 = vector.extract_strided_slice %50 {offsets = [24, 128], sizes = [8, 128], strides = [1, 1]} : vector<128x256xf32> to vector<8x128xf32>
      %65 = arith.addf %63, %64 : vector<8x128xf32>
      %66 = vector.extract_strided_slice %50 {offsets = [32, 0], sizes = [8, 128], strides = [1, 1]} : vector<128x256xf32> to vector<8x128xf32>
      %67 = arith.addf %65, %66 : vector<8x128xf32>
      %68 = vector.extract_strided_slice %50 {offsets = [32, 128], sizes = [8, 128], strides = [1, 1]} : vector<128x256xf32> to vector<8x128xf32>
      %69 = arith.addf %67, %68 : vector<8x128xf32>
      %70 = vector.extract_strided_slice %50 {offsets = [40, 0], sizes = [8, 128], strides = [1, 1]} : vector<128x256xf32> to vector<8x128xf32>
      %71 = arith.addf %69, %70 : vector<8x128xf32>
      %72 = vector.extract_strided_slice %50 {offsets = [40, 128], sizes = [8, 128], strides = [1, 1]} : vector<128x256xf32> to vector<8x128xf32>
      %73 = arith.addf %71, %72 : vector<8x128xf32>
      %74 = vector.extract_strided_slice %50 {offsets = [48, 0], sizes = [8, 128], strides = [1, 1]} : vector<128x256xf32> to vector<8x128xf32>
      %75 = arith.addf %73, %74 : vector<8x128xf32>
      %76 = vector.extract_strided_slice %50 {offsets = [48, 128], sizes = [8, 128], strides = [1, 1]} : vector<128x256xf32> to vector<8x128xf32>
      %77 = arith.addf %75, %76 : vector<8x128xf32>
      %78 = vector.extract_strided_slice %50 {offsets = [56, 0], sizes = [8, 128], strides = [1, 1]} : vector<128x256xf32> to vector<8x128xf32>
      %79 = arith.addf %77, %78 : vector<8x128xf32>
      %80 = vector.extract_strided_slice %50 {offsets = [56, 128], sizes = [8, 128], strides = [1, 1]} : vector<128x256xf32> to vector<8x128xf32>
      %81 = arith.addf %79, %80 : vector<8x128xf32>
      %82 = vector.extract_strided_slice %50 {offsets = [64, 0], sizes = [8, 128], strides = [1, 1]} : vector<128x256xf32> to vector<8x128xf32>
      %83 = arith.addf %81, %82 : vector<8x128xf32>
      %84 = vector.extract_strided_slice %50 {offsets = [64, 128], sizes = [8, 128], strides = [1, 1]} : vector<128x256xf32> to vector<8x128xf32>
      %85 = arith.addf %83, %84 : vector<8x128xf32>
      %86 = vector.extract_strided_slice %50 {offsets = [72, 0], sizes = [8, 128], strides = [1, 1]} : vector<128x256xf32> to vector<8x128xf32>
      %87 = arith.addf %85, %86 : vector<8x128xf32>
      %88 = vector.extract_strided_slice %50 {offsets = [72, 128], sizes = [8, 128], strides = [1, 1]} : vector<128x256xf32> to vector<8x128xf32>
      %89 = arith.addf %87, %88 : vector<8x128xf32>
      %90 = vector.extract_strided_slice %50 {offsets = [80, 0], sizes = [8, 128], strides = [1, 1]} : vector<128x256xf32> to vector<8x128xf32>
      %91 = arith.addf %89, %90 : vector<8x128xf32>
      %92 = vector.extract_strided_slice %50 {offsets = [80, 128], sizes = [8, 128], strides = [1, 1]} : vector<128x256xf32> to vector<8x128xf32>
      %93 = arith.addf %91, %92 : vector<8x128xf32>
      %94 = vector.extract_strided_slice %50 {offsets = [88, 0], sizes = [8, 128], strides = [1, 1]} : vector<128x256xf32> to vector<8x128xf32>
      %95 = arith.addf %93, %94 : vector<8x128xf32>
      %96 = vector.extract_strided_slice %50 {offsets = [88, 128], sizes = [8, 128], strides = [1, 1]} : vector<128x256xf32> to vector<8x128xf32>
      %97 = arith.addf %95, %96 : vector<8x128xf32>
      %98 = vector.extract_strided_slice %50 {offsets = [96, 0], sizes = [8, 128], strides = [1, 1]} : vector<128x256xf32> to vector<8x128xf32>
      %99 = arith.addf %97, %98 : vector<8x128xf32>
      %100 = vector.extract_strided_slice %50 {offsets = [96, 128], sizes = [8, 128], strides = [1, 1]} : vector<128x256xf32> to vector<8x128xf32>
      %101 = arith.addf %99, %100 : vector<8x128xf32>
      %102 = vector.extract_strided_slice %50 {offsets = [104, 0], sizes = [8, 128], strides = [1, 1]} : vector<128x256xf32> to vector<8x128xf32>
      %103 = arith.addf %101, %102 : vector<8x128xf32>
      %104 = vector.extract_strided_slice %50 {offsets = [104, 128], sizes = [8, 128], strides = [1, 1]} : vector<128x256xf32> to vector<8x128xf32>
      %105 = arith.addf %103, %104 : vector<8x128xf32>
      %106 = vector.extract_strided_slice %50 {offsets = [112, 0], sizes = [8, 128], strides = [1, 1]} : vector<128x256xf32> to vector<8x128xf32>
      %107 = arith.addf %105, %106 : vector<8x128xf32>
      %108 = vector.extract_strided_slice %50 {offsets = [112, 128], sizes = [8, 128], strides = [1, 1]} : vector<128x256xf32> to vector<8x128xf32>
      %109 = arith.addf %107, %108 : vector<8x128xf32>
      %110 = vector.extract_strided_slice %50 {offsets = [120, 0], sizes = [8, 128], strides = [1, 1]} : vector<128x256xf32> to vector<8x128xf32>
      %111 = arith.addf %109, %110 : vector<8x128xf32>
      %112 = vector.extract_strided_slice %50 {offsets = [120, 128], sizes = [8, 128], strides = [1, 1]} : vector<128x256xf32> to vector<8x128xf32>
      %113 = arith.addf %111, %112 : vector<8x128xf32>
      %c0_31 = arith.constant 0 : index
      %c0_32 = arith.constant 0 : index
      %114 = vector.load %arg11[%c0_31, %c0_32] : memref<8x128xf32, #tpu.memory_space<vmem>>, vector<8x128xf32>
      %115 = arith.addf %114, %113 : vector<8x128xf32>
      %c0_33 = arith.constant 0 : index
      %c0_34 = arith.constant 0 : index
      %116 = vector.load %arg11[%c0_33, %c0_34] : memref<8x128xf32, #tpu.memory_space<vmem>>, vector<8x128xf32>
      tpu.vector_store %arg11[%c0_33, %c0_34], %115 {strides = array<i32>} : memref<8x128xf32, #tpu.memory_space<vmem>>, vector<8x128xf32>,
    } else {
    }
    %c0_i32_13 = arith.constant 0 : i32
    %17 = arith.cmpi eq, %arg1, %c0_i32_13 : i32
    %c0_i32_14 = arith.constant 0 : i32
    %18 = arith.cmpi eq, %arg2, %c0_i32_14 : i32
    %19 = arith.andi %17, %18 : i1
    %20 = arith.extui %19 : i1 to i32
    %c0_i32_15 = arith.constant 0 : i32
    %21 = arith.cmpi ne, %20, %c0_i32_15 : i32
    scf.if %21 {
      %c0_16 = arith.constant 0 : index
      %c0_17 = arith.constant 0 : index
      %22 = vector.load %arg11[%c0_16, %c0_17] : memref<8x128xf32, #tpu.memory_space<vmem>>, vector<8x128xf32>
      %23 = vector.shape_cast %22 : vector<8x128xf32> to vector<1x8x128xf32>
      %cst_18 = arith.constant dense<0.000000e+00> : vector<1xf32>
      %24 = vector.multi_reduction <add>, %23, %cst_18 [1, 2] : vector<1x8x128xf32> to vector<1xf32>
      %25 = vector.shape_cast %24 : vector<1xf32> to vector<1x1x1xf32>
      %26 = vector.extract %25[0, 0, 0] : f32 from vector<1x1x1xf32>
      %27 = vector.broadcast %26 : f32 to vector<1x1xf32>
      %cst_19 = arith.constant 1.52587891E-5 : f32
      %28 = vector.broadcast %cst_19 : f32 to vector<1x1xf32>
      %29 = arith.mulf %27, %28 : vector<1x1xf32>
      %30 = vector.shape_cast %29 : vector<1x1xf32> to vector<1x1xf32>
      %31 = vector.broadcast %30 : vector<1x1xf32> to vector<1x128xf32>
      %c0_20 = arith.constant 0 : index
      %c0_21 = arith.constant 0 : index
      %32 = vector.load %arg9[%c0_20, %c0_21] : memref<1x128xf32, #tpu.memory_space<vmem>>, vector<1x128xf32>
      tpu.vector_store %arg9[%c0_20, %c0_21], %31 {strides = array<i32>} : memref<1x128xf32, #tpu.memory_space<vmem>>, vector<1x128xf32>,
    } else {
    }
    return
  }
  func.func @transform_0(%arg0: i32, %arg1: i32, %arg2: i32) -> (i32, i32) {
    %c0_i32 = arith.constant 0 : i32
    return %arg0, %arg2 : i32, i32
  }
  func.func @transform_1(%arg0: i32, %arg1: i32, %arg2: i32) -> (i32, i32) {
    %c0_i32 = arith.constant 0 : i32
    return %arg1, %arg2 : i32, i32
  }
  func.func @transform_2(%arg0: i32, %arg1: i32, %arg2: i32) -> (i32, i32) {
    %c0_i32 = arith.constant 0 : i32
    %c0_i32_0 = arith.constant 0 : i32
    return %arg0, %c0_i32 : i32, i32
  }
  func.func @transform_3(%arg0: i32, %arg1: i32, %arg2: i32) -> (i32, i32) {
    %c0_i32 = arith.constant 0 : i32
    %c0_i32_0 = arith.constant 0 : i32
    return %c0_i32, %arg1 : i32, i32
  }
  func.func @transform_4(%arg0: i32, %arg1: i32, %arg2: i32) -> (i32, i32) {
    %c0_i32 = arith.constant 0 : i32
    %c0_i32_0 = arith.constant 0 : i32
    return %c0_i32, %arg1 : i32, i32
  }
  func.func @transform_5(%arg0: i32, %arg1: i32, %arg2: i32) -> (i32, i32) {
    %c0_i32 = arith.constant 0 : i32
    %c0_i32_0 = arith.constant 0 : i32
    return %arg0, %c0_i32 : i32, i32
  }
  func.func @transform_6(%arg0: i32, %arg1: i32, %arg2: i32) -> (i32, i32) {
    %c0_i32 = arith.constant 0 : i32
    %c0_i32_0 = arith.constant 0 : i32
    return %c0_i32, %arg0 : i32, i32
  }
}

</mosaic_0001>

<bundles_post_ra>
// kernel: tpu_custom_call.1
= control target key start
LH: loop header
LB: loop body
LE: loop exit
PB: predicated region body
PF: predicated region fallthrough
CT: control target
= control target key end

     0   :  { %11 = vsyncpa [#allocation5], 0  ;;  %s3299_s0 = inlined_call_operand.vmem [shape: bf16[256,256], index: 0, kind: input, shape index: {}]   ;;  %s3300_s1 = inlined_call_operand.vmem [shape: bf16[256,256], index: 1, kind: input, shape index: {}]   ;;  %s3301_s2 = inlined_call_operand.vmem [shape: f32[256,1], index: 2, kind: input, shape index: {}]   ;;  %s3302_s3 = inlined_call_operand.vmem [shape: f32[1,256], index: 3, kind: input, shape index: {}]   ;;  %s3303_s4 = inlined_call_operand.vmem [shape: s32[1,256], index: 4, kind: input, shape index: {}]   ;;  %s3304_s5 = inlined_call_operand.vmem [shape: s32[256,1], index: 5, kind: input, shape index: {}]   ;;  %s3305_s6 = inlined_call_operand.hbm [shape: f32[1,256], index: 6, kind: output, shape index: {}]  }
   0x1   :  { %13 = vsyncpa [#allocation5 + $0x1], 0  ;;  %s2424_s21 = smov 0   ;;  %s2426_s22 = smov 0  }
   0x2   :  { %s2428_s23 = smov 0   ;;  %s2430_s24 = smov 0  }
   0x3   :  { %s2432_s25 = smov 0   ;;  %s2434_s26 = smov 0  }
   0x4 LB: > { %s1914_s27 = sadd.s32 4294967295, %s2384_s26   ;;  %s1915_s28 = sadd.s32 4294967294, %s2384_s26   ;;  %s2384_s26 = sphi %s2434_s26, %s19_s26   ;;  %s2380_s25 = sphi %s2432_s25, %s3350_s25   ;;  %s2376_s24 = sphi %s2430_s24, %s3349_s24   ;;  %s2372_s23 = sphi %s2428_s23, %s3348_s23   ;;  %s2368_s22 = sphi %s2426_s22, %s3347_s22   ;;  %s2364_s21 = sphi %s2424_s21, %s3346_s21  }
   0x5   : > { %s38_s29 = sadd.s32 1, %s2380_s25  ;;  %s205_s30 = sadd.s32 1, %s2372_s23 }
   0x6   : > { %p40_p0 = scmp.ge.s32.totalorder %s38_s29, 2  ;;  %p215_p1 = scmp.ne.s32.totalorder %s2372_s23, %s2368_s22 }
   0x7   : > { %p216_p2 = scmp.eq.s32.totalorder %s1914_s27, 1  ;;  %p221_p3 = scmp.ne.s32.totalorder %s2368_s22, %s2364_s21 }
   0x8   : > { %s3352_s29 = smov (%p40_p0, %s38_s29), 0  ;;  %p222_p5 = scmp.eq.s32.totalorder %s1915_s28, 1 }
   0x9   : > { %p2464_p4 = por %p216_p2, %p215_p1  ;;  %s202_s8 = ssub.s32 %s2380_s25, %s3352_s29 }
   0xa   : > { %p1921_p6 = scmp.ge.s32.totalorder %s2384_s26, 1  ;;  %p203_p7 = scmp.eq.s32.totalorder %s202_s8, 0 }
   0xb   : > { %p2471_p8 = por %p222_p5, %p221_p3  ;;  %p304_p9 = scmp.lt.s32.totalorder %s2384_s26, 3 }
   0xc   : > { %s2477_s10 = scalar_select %p203_p7, %s2372_s23, %s205_s30  }
   0xd   : > { %p305_p10 = pnand %p1921_p6, %p304_p9 }
   0xf   : > { %308 = sbr.rel (%p305_p10) target bundleno = 734 (0x2de), region = 44 }
  0x16   : > { %v2106_v0 = vld [vmem:[%s3300_s1 + $0x4] ss:$8 sps:$4 sm:$0xff]   ;;  %v2108_v1 = vld [vmem:[%s3300_s1] ss:$8 sps:$4 sm:$0xff]   ;;  %v2109_v2 = vld [vmem:[%s3300_s1 + $0x14] ss:$8 sps:$4 sm:$0xff]  }
  0x17   : > { %774 = vmatprep.subr.bf16.mxu0 %v2106_v0  ;;  %2013 = vmatprep.subr.bf16.mxu1 %v2106_v0  ;;  %s2489_s17 = sshll.u32 %s2376_s24, 4  ;;  %v2111_v3 = vld [vmem:[%s3300_s1 + $0x10] ss:$8 sps:$4 sm:$0xff]   ;;  %v2112_v4 = vld [vmem:[%s3300_s1 + $0x24] ss:$8 sps:$4 sm:$0xff]   ;;  %v2386_v7 = vmov 0  }
  0x18   : > { %775 = vmatpush1.bf16.xpose.msra.mxu0 %v2108_v1  ;;  %2029 = vmatpush1.bf16.xpose.msra.mxu1 %v2108_v1  ;;  %p368_p11 = scmp.lt.s32.totalorder %s2489_s17, 31  ;;  %v2114_v5 = vld [vmem:[%s3300_s1 + $0x20] ss:$8 sps:$4 sm:$0xff]   ;;  %v2115_v6 = vld [vmem:[%s3300_s1 + $0x34] ss:$8 sps:$4 sm:$0xff]   ;;  %s364_s14 = sand.u32 1, %s2368_s22  }
  0x19   : > { %776 = vmatprep.subr.bf16.mxu0 %v2109_v2  ;;  %2014 = vmatprep.subr.bf16.mxu1 %v2109_v2  ;;  %v2117_v9 = vld [vmem:[%s3300_s1 + $0x30] ss:$8 sps:$4 sm:$0xff]   ;;  %v2118_v11 = vld [vmem:[%s3300_s1 + $0x44] ss:$8 sps:$4 sm:$0xff]   ;;  %v2120_v12 = vld [vmem:[%s3300_s1 + $0x40] ss:$8 sps:$4 sm:$0xff]   ;;  %s3252_s20 = scalar_lea.hbm %s3305_s6, %s2489_s17 }
  0x1a   : > { %s369_s28 = scalar_select %p368_p11, %s2489_s17, 31  ;;  %2104 = vset.pattern.permute.xlu0 %v2386_v7  ;;  %2105 = vset.pattern.permute.xlu1 %v2386_v7  ;;  %v2121_v14 = vld [vmem:[%s3300_s1 + $0x54] ss:$8 sps:$4 sm:$0xff]   ;;  %v2123_v20 = vld [vmem:[%s3300_s1 + $0x50] ss:$8 sps:$4 sm:$0xff]  }
  0x1b   : > { %v2124_v21 = vld [vmem:[%s3300_s1 + $0x64] ss:$8 sps:$4 sm:$0xff]   ;;  %v2126_v26 = vld [vmem:[%s3300_s1 + $0x60] ss:$8 sps:$4 sm:$0xff]   ;;  %v2127_v27 = vld [vmem:[%s3300_s1 + $0x74] ss:$8 sps:$4 sm:$0xff]  }
  0x1c   : > { %s2505_s12 = sshll.u32 %s369_s28, 3  ;;  %v2129_v32 = vld [vmem:[%s3300_s1 + $0x70] ss:$8 sps:$4 sm:$0xff]   ;;  %v2130_v33 = vld [vmem:[%s3300_s1 + $0x84] ss:$8 sps:$4 sm:$0xff]   ;;  %s1761_s27 = scalar_lea.sflag [#allocation5], %s364_s14 }
  0x1d   : > { %s2511_s15 = scalar_lea.vmem %s3299_s0, %s2505_s12  ;;  %s2525_s30 = scalar_lea.vmem %s3301_s2, %s2505_s12  ;;  %v2132_v38 = vld [vmem:[%s3300_s1 + $0x80] ss:$8 sps:$4 sm:$0xff]   ;;  %v2133_v39 = vld [vmem:[%s3300_s1 + $0x94] ss:$8 sps:$4 sm:$0xff]   ;;  %v2135_v44 = vld [vmem:[%s3300_s1 + $0x90] ss:$8 sps:$4 sm:$0xff]  }
  0x1e   : > { %v2156_v8 = vld [vmem:[%s2511_s15 + $0x4] ss:$8 sps:$4 sm:$0xff]   ;;  %v958_v15 = vld [vmem:[%s2525_s30 + $0x10] sm:$0xff]  ;;  %v959_v17 = vld [vmem:[%s2525_s30 + $0x18] sm:$0xff]  ;;  %s2551_s28 = scalar_lea.vmem %s3304_s5, %s2505_s12  ;;  %s2388_s24 = smov [#allocation4]  }
  0x1f   : > { %v2159_v10 = vld [vmem:[%s2511_s15 + $0x44] ss:$8 sps:$4 sm:$0xff]   ;;  %806 = vmatprep.mubr.bf16.mxu0 %v2156_v8  ;;  %984 = vperm.xlu1 %2105, %v958_v15   ;;  %v962_v22 = vld [vmem:[%s2525_s30 + $0x30] sm:$0xff]  ;;  %v963_v23 = vld [vmem:[%s2525_s30 + $0x38] sm:$0xff]  ;;  %s2310_s11 = sshll.u32 %s2388_s24, 4  ;;  %s2311_s11 = int_to_ptr.vmem [resolvable:$false] %s2310_s11 }
  0x20   : > { %777 = vmatpush1.bf16.xpose.msra.mxu0 %v2111_v3  ;;  %2030 = vmatpush1.bf16.xpose.msra.mxu1 %v2111_v3  ;;  %v956_v13 = vld [vmem:[%s2525_s30] sm:$0xff]  ;;  %v957_v16 = vld [vmem:[%s2525_s30 + $0x8] sm:$0xff]  ;;  %v966_v30 = vld [vmem:[%s2525_s30 + $0x50] sm:$0xff]  ;;  %s2312_s13 = scalar_lea.vmem %s2311_s11, 32 }
  0x21   : > { %778 = vmatprep.subr.bf16.mxu0 %v2112_v4  ;;  %2015 = vmatprep.subr.bf16.mxu1 %v2112_v4  ;;  %v960_v18 = vld [vmem:[%s2525_s30 + $0x20] sm:$0xff]  ;;  %v961_v19 = vld [vmem:[%s2525_s30 + $0x28] sm:$0xff]  ;;  %v1225_v31 = vld [vmem:[%s2551_s28 + $0x10] sm:$0xff] }
  0x22   : > { %846 = vmatprep.mubr.bf16.mxu1 %v2159_v10  ;;  %974 = vperm.xlu0 %2104, %v956_v13   ;;  %v964_v24 = vld [vmem:[%s2525_s30 + $0x40] sm:$0xff]  ;;  %v965_v28 = vld [vmem:[%s2525_s30 + $0x48] sm:$0xff]  ;;  %v967_v34 = vld [vmem:[%s2525_s30 + $0x58] sm:$0xff] }
  0x23   : > { %989 = vperm.xlu1 %2105, %v959_v17   ;;  %v1223_v25 = vld [vmem:[%s2551_s28] sm:$0xff]  ;;  %v1224_v29 = vld [vmem:[%s2551_s28 + $0x8] sm:$0xff]  ;;  %v1226_v35 = vld [vmem:[%s2551_s28 + $0x18] sm:$0xff]  ;;  %v1053_v17 = vlaneseq }
  0x24   : > { %v968_v36 = vld [vmem:[%s2525_s30 + $0x60] sm:$0xff]  ;;  %v969_v40 = vld [vmem:[%s2525_s30 + $0x68] sm:$0xff]  ;;  %v970_v42 = vld [vmem:[%s2525_s30 + $0x70] sm:$0xff] }
  0x25   : > { %v1227_v37 = vld [vmem:[%s2551_s28 + $0x20] sm:$0xff]  ;;  %v1228_v41 = vld [vmem:[%s2551_s28 + $0x28] sm:$0xff]  ;;  %v1229_v43 = vld [vmem:[%s2551_s28 + $0x30] sm:$0xff] }
  0x26   : > { %979 = vperm.xlu0 %2104, %v957_v16   ;;  %v2136_v45 = vld [vmem:[%s3300_s1 + $0xa4] ss:$8 sps:$4 sm:$0xff]   ;;  %v971_v46 = vld [vmem:[%s2525_s30 + $0x78] sm:$0xff]  ;;  %v2138_v50 = vld [vmem:[%s3300_s1 + $0xa0] ss:$8 sps:$4 sm:$0xff]  }
  0x27   : > { %999 = vperm.xlu1 %2105, %v961_v19   ;;  %v1230_v47 = vld [vmem:[%s2551_s28 + $0x38] sm:$0xff]  ;;  %v1231_v48 = vld [vmem:[%s2551_s28 + $0x40] sm:$0xff]  ;;  %v1232_v49 = vld [vmem:[%s2551_s28 + $0x48] sm:$0xff] }
  0x28   : > { %779 = vmatpush1.bf16.xpose.msra.mxu0 %v2114_v5  ;;  %2031 = vmatpush1.bf16.xpose.msra.mxu1 %v2114_v5  ;;  %v2139_v51 = vld [vmem:[%s3300_s1 + $0xb4] ss:$8 sps:$4 sm:$0xff]   ;;  %v1235_v54 = vld [vmem:[%s2551_s28 + $0x60] sm:$0xff]  ;;  %v1236_v55 = vld [vmem:[%s2551_s28 + $0x68] sm:$0xff] }
  0x29   : > { %780 = vmatprep.subr.bf16.mxu0 %v2115_v6  ;;  %2016 = vmatprep.subr.bf16.mxu1 %v2115_v6  ;;  %v1233_v52 = vld [vmem:[%s2551_s28 + $0x50] sm:$0xff]  ;;  %v1234_v53 = vld [vmem:[%s2551_s28 + $0x58] sm:$0xff]  ;;  %v2142_v57 = vld [vmem:[%s3300_s1 + $0xc4] ss:$8 sps:$4 sm:$0xff]  }
  0x2a   : > { %994 = vperm.xlu0 %2104, %v960_v18   ;;  %v2141_v56 = vld [vmem:[%s3300_s1 + $0xb0] ss:$8 sps:$4 sm:$0xff]   ;;  %v2144_v60 = vld [vmem:[%s3300_s1 + $0xc0] ss:$8 sps:$4 sm:$0xff]   ;;  %v2145_v61 = vld [vmem:[%s3300_s1 + $0xd4] ss:$8 sps:$4 sm:$0xff]  }
  0x2b   : > { %1009 = vperm.xlu1 %2105, %v963_v23   ;;  %v1237_v58 = vld [vmem:[%s2551_s28 + $0x70] sm:$0xff]  ;;  %v1238_v59 = vld [vmem:[%s2551_s28 + $0x78] sm:$0xff]  ;;  %v2148_v63 = vld [vmem:[%s3300_s1 + $0xe4] ss:$8 sps:$4 sm:$0xff]   ;;  %v2648_v18 = vshrl.u32 %v1053_v17, 7  ;;  %s365_s28 = scalar_lea.vmem [#allocation4], %s364_s14 }
  0x2c   : > { %v2147_v62 = vld [vmem:[%s3300_s1 + $0xd0] ss:$8 sps:$4 sm:$0xff]   ;;  %v2150_v0 = vld [vmem:[%s3300_s1 + $0xe0] ss:$8 sps:$4 sm:$0xff]   ;;  %v2151_v1 = vld [vmem:[%s3300_s1 + $0xf4] ss:$8 sps:$4 sm:$0xff]  }
  0x2d   : > { %v2153_v2 = vld [vmem:[%s3300_s1 + $0xf0] ss:$8 sps:$4 sm:$0xff]   ;;  %v2154_v3 = vld [vmem:[%s2511_s15] ss:$8 sps:$4 sm:$0xff]   ;;  %v2160_v5 = vld [vmem:[%s2511_s15 + $0x14] ss:$8 sps:$4 sm:$0xff]  }
  0x2e   : > { %1004 = vperm.xlu0 %2104, %v962_v22   ;;  %v2157_v4 = vld [vmem:[%s2511_s15 + $0x40] ss:$8 sps:$4 sm:$0xff]   ;;  %v2162_v6 = vld [vmem:[%s2511_s15 + $0x54] ss:$8 sps:$4 sm:$0xff]   ;;  %v2164_v7 = vld [vmem:[%s2511_s15 + $0x10] ss:$8 sps:$4 sm:$0xff]  }
  0x2f   : > { %1240 = vperm.xlu1 %2105, %v1223_v25   ;;  %v2165_v8 = vld [vmem:[%s2511_s15 + $0x50] ss:$8 sps:$4 sm:$0xff]   ;;  %v2168_v10 = vld [vmem:[%s2511_s15 + $0x64] ss:$8 sps:$4 sm:$0xff]   ;;  %v2172_v13 = vld [vmem:[%s2511_s15 + $0x34] ss:$8 sps:$4 sm:$0xff]  }
  0x30   : > { %781 = vmatpush1.bf16.xpose.msra.mxu0 %v2117_v9  ;;  %2032 = vmatpush1.bf16.xpose.msra.mxu1 %v2117_v9  ;;  %v2166_v9 = vld [vmem:[%s2511_s15 + $0x24] ss:$8 sps:$4 sm:$0xff]   ;;  %v2176_v15 = vld [vmem:[%s2511_s15 + $0x30] ss:$8 sps:$4 sm:$0xff]   ;;  %v955_v22 = vld [vmem:[%s3302_s3] sm:$0x3] }
  0x31   : > { %782 = vmatprep.subr.bf16.mxu0 %v2118_v11  ;;  %2017 = vmatprep.subr.bf16.mxu1 %v2118_v11  ;;  %v2170_v11 = vld [vmem:[%s2511_s15 + $0x20] ss:$8 sps:$4 sm:$0xff]   ;;  %v2177_v16 = vld [vmem:[%s2511_s15 + $0x70] ss:$8 sps:$4 sm:$0xff]   ;;  %v1059_v23 = vsub.s32 1, %v2648_v18  ;;  %s1773_s16 = sshll.u32 %s365_s28, 4  ;;  %s3254_s16 = int_to_ptr.vmem [resolvable:$true] %s1773_s16 }
  0x32   : > { %1014 = vperm.xlu0 %2104, %v964_v24   ;;  %s2306_s8 = scalar_lea.vmem %s3254_s16, 16  ;;  %p2313_p1 = scmp.lt.s32.totalorder %s3254_s16, %s2311_s11 }
  0x33   : > { %1243 = vperm.xlu1 %2105, %v1224_v29   ;;  %p2307_p12 = scmp.ne.s32.totalorder %s3254_s16, %s2306_s8  ;;  %p2314_p2 = scmp.lt.s32.totalorder %s2312_s13, %s2306_s8 }
  0x35   : > { %p2308_p13 = pnand %p2307_p12, %p2464_p4  ;;  %p2315_p3 = por %p2314_p2, %p2313_p1 }
  0x36   : > { %1019 = vperm.xlu0 %2104, %v965_v28  }
  0x37   : > { %1246 = vperm.xlu1 %2105, %v1225_v31   ;;  %p2309_p0 = pneg %p2308_p13 }
  0x38   : > { %783 = vmatpush1.bf16.xpose.msra.mxu0 %v2120_v12  ;;  %2033 = vmatpush1.bf16.xpose.msra.mxu1 %v2120_v12  ;;  %v2171_v12 = vld [vmem:[%s2511_s15 + $0x60] ss:$8 sps:$4 sm:$0xff]  }
  0x39   : > { %784 = vmatprep.subr.bf16.mxu0 %v2121_v14  ;;  %2018 = vmatprep.subr.bf16.mxu1 %v2121_v14  ;;  %v2174_v14 = vld [vmem:[%s2511_s15 + $0x74] ss:$8 sps:$4 sm:$0xff]   ;;  %p2316_p5 = pnand %p2315_p3, %p2309_p0 }
  0x3a   : > { %1024 = vperm.xlu0 %2104, %v966_v30  }
  0x3b   : > { %1249 = vperm.xlu1 %2105, %v1226_v35  }
  0x3e   : > { %1029 = vperm.xlu0 %2104, %v967_v34  }
  0x3f   : > { %1252 = vperm.xlu1 %2105, %v1227_v37  }
  0x40   : > { %785 = vmatpush1.bf16.xpose.msra.mxu0 %v2123_v20  ;;  %2034 = vmatpush1.bf16.xpose.msra.mxu1 %v2123_v20 }
  0x41   : > { %786 = vmatprep.subr.bf16.mxu0 %v2124_v21  ;;  %2019 = vmatprep.subr.bf16.mxu1 %v2124_v21  ;;  %v1055_v21 = vsub.s32 0, %v2648_v18 }
  0x42   : > { %1034 = vperm.xlu0 %2104, %v968_v36  }
  0x43   : > { %1255 = vperm.xlu1 %2105, %v1228_v41  }
  0x46   : > { %1039 = vperm.xlu0 %2104, %v969_v40  }
  0x47   : > { %1258 = vperm.xlu1 %2105, %v1229_v43  }
  0x48   : > { %787 = vmatpush1.bf16.xpose.msra.mxu0 %v2126_v26  ;;  %2035 = vmatpush1.bf16.xpose.msra.mxu1 %v2126_v26  ;;  %v2659_v26 = vrot.slane %v955_v22, %v1055_v21 }
  0x49   : > { %788 = vmatprep.subr.bf16.mxu0 %v2127_v27  ;;  %2020 = vmatprep.subr.bf16.mxu1 %v2127_v27  ;;  %v2663_v27 = vrot.slane %v955_v22, %v1059_v23 }
  0x4a   : > { %1044 = vperm.xlu0 %2104, %v970_v42  }
  0x4b   : > { %1261 = vperm.xlu1 %2105, %v1230_v47  }
  0x4e   : > { %1049 = vperm.xlu0 %2104, %v971_v46  }
  0x4f   : > { %1267 = vperm.xlu1 %2105, %v1232_v49  }
  0x50   : > { %789 = vmatpush1.bf16.xpose.msra.mxu0 %v2129_v32  ;;  %2036 = vmatpush1.bf16.xpose.msra.mxu1 %v2129_v32 }
  0x51   : > { %790 = vmatprep.subr.bf16.mxu0 %v2130_v33  ;;  %2021 = vmatprep.subr.bf16.mxu1 %v2130_v33 }
  0x52   : > { %1264 = vperm.xlu0 %2104, %v1231_v48  }
  0x53   : > { %1273 = vperm.xlu1 %2105, %v1234_v53  }
  0x56   : > { %1270 = vperm.xlu0 %2104, %v1233_v52  }
  0x57   : > { %1279 = vperm.xlu1 %2105, %v1236_v55  }
  0x58   : > { %791 = vmatpush1.bf16.xpose.msra.mxu0 %v2132_v38  ;;  %2037 = vmatpush1.bf16.xpose.msra.mxu1 %v2132_v38 }
  0x59   : > { %792 = vmatprep.subr.bf16.mxu0 %v2133_v39  ;;  %2022 = vmatprep.subr.bf16.mxu1 %v2133_v39 }
  0x5a   : > { %1276 = vperm.xlu0 %2104, %v1235_v54  }
  0x5b   : > { %1285 = vperm.xlu1 %2105, %v1238_v59  }
  0x5e   : > { %1282 = vperm.xlu0 %2104, %v1237_v58  }
  0x60   : > { %793 = vmatpush1.bf16.xpose.msra.mxu0 %v2135_v44  ;;  %2038 = vmatpush1.bf16.xpose.msra.mxu1 %v2135_v44 }
  0x61   : > { %794 = vmatprep.subr.bf16.mxu0 %v2136_v45  ;;  %2023 = vmatprep.subr.bf16.mxu1 %v2136_v45 }
  0x68   : > { %795 = vmatpush1.bf16.xpose.msra.mxu0 %v2138_v50  ;;  %2039 = vmatpush1.bf16.xpose.msra.mxu1 %v2138_v50 }
  0x69   : > { %796 = vmatprep.subr.bf16.mxu0 %v2139_v51  ;;  %2024 = vmatprep.subr.bf16.mxu1 %v2139_v51 }
  0x70   : > { %797 = vmatpush1.bf16.xpose.msra.mxu0 %v2141_v56  ;;  %2040 = vmatpush1.bf16.xpose.msra.mxu1 %v2141_v56 }
  0x71   : > { %798 = vmatprep.subr.bf16.mxu0 %v2142_v57  ;;  %2025 = vmatprep.subr.bf16.mxu1 %v2142_v57 }
  0x78   : > { %799 = vmatpush1.bf16.xpose.msra.mxu0 %v2144_v60  ;;  %2041 = vmatpush1.bf16.xpose.msra.mxu1 %v2144_v60 }
  0x79   : > { %800 = vmatprep.subr.bf16.mxu0 %v2145_v61  ;;  %2026 = vmatprep.subr.bf16.mxu1 %v2145_v61 }
  0x80   : > { %801 = vmatpush1.bf16.xpose.msra.mxu0 %v2147_v62  ;;  %2042 = vmatpush1.bf16.xpose.msra.mxu1 %v2147_v62 }
  0x81   : > { %802 = vmatprep.subr.bf16.mxu0 %v2148_v63  ;;  %2027 = vmatprep.subr.bf16.mxu1 %v2148_v63 }
  0x88   : > { %803 = vmatpush1.bf16.xpose.msra.mxu0 %v2150_v0  ;;  %2043 = vmatpush1.bf16.xpose.msra.mxu1 %v2150_v0 }
  0x89   : > { %804 = vmatprep.subr.bf16.mxu0 %v2151_v1  ;;  %2028 = vmatprep.subr.bf16.mxu1 %v2151_v1 }
  0x90   : > { %805 = vmatpush1.bf16.xpose.msra.mxu0 %v2153_v2  ;;  %2044 = vmatpush1.bf16.xpose.msra.mxu1 %v2153_v2 }
  0x97   : > { %807 = vmatmul.mubr.bf16.vlgmr.msra.gmra.mrb[0].mxu0 %v2154_v3  ;;  %847 = vmatmul.mubr.bf16.vlgmr.msra.gmra.mrb[0].mxu1 %v2157_v4 }
  0x98   : > { %816 = vmatprep.mubr.bf16.mxu0 %v2160_v5  ;;  %856 = vmatprep.mubr.bf16.mxu1 %v2162_v6 }
  0x9e   : > { %v985_v20 = vpop.permute.xlu1 %984 }
  0x9f   : > { %817 = vmatmul.mubr.bf16.gmra.mrb[4].mxu0 %v2164_v7  ;;  %857 = vmatmul.mubr.bf16.gmra.mrb[4].mxu1 %v2165_v8  ;;  %v1067_v1 = vadd.f32 %v2659_v26, %v985_v20  ;;  %v1068_v8 = vadd.f32 %v2663_v27, %v985_v20 }
  0xa0   : > { %826 = vmatprep.mubr.bf16.mxu0 %v2166_v9  ;;  %866 = vmatprep.mubr.bf16.mxu1 %v2168_v10 }
  0xa1   : > { %v975_v19 = vpop.permute.xlu0 %974 }
  0xa2   : > { %v2655_v25 = vpop.permute.xlu1 %989  ;;  %v1063_v28 = vadd.f32 %v2659_v26, %v975_v19  ;;  %v1064_v31 = vadd.f32 %v2663_v27, %v975_v19 }
  0xa5   : > { %v980_v24 = vpop.permute.xlu0 %979 }
  0xa6   : > { %v2668_v30 = vpop.permute.xlu1 %999  ;;  %v1065_v40 = vadd.f32 %v2659_v26, %v980_v24  ;;  %v1066_v45 = vadd.f32 %v2663_v27, %v980_v24  ;;  %v1069_v24 = vadd.f32 %v2659_v26, %v2655_v25 }
  0xa7   : > { %827 = vmatmul.mubr.bf16.gmra.mrb[8].mxu0 %v2170_v11  ;;  %867 = vmatmul.mubr.bf16.gmra.mrb[8].mxu1 %v2171_v12 }
  0xa8   : > { %836 = vmatprep.mubr.bf16.mxu0 %v2172_v13  ;;  %876 = vmatprep.mubr.bf16.mxu1 %v2174_v14  ;;  %v954_v14 = vld [vmem:[%s3303_s4] sm:$0x3] }
  0xa9   : > { %v2666_v29 = vpop.permute.xlu0 %994 }
  0xaa   : > { %v2685_v52 = vpop.permute.xlu1 %1009 }
  0xad   : > { %v1005_v57 = vpop.permute.xlu0 %1004 }
  0xae   : > { %v1241_v9 = vpop.permute.xlu1 %1240 }
  0xaf   : > { %837 = vmatmul.mubr.bf16.gmra.mrb[12].mxu0 %v2176_v15  ;;  %877 = vmatmul.mubr.bf16.gmra.mrb[12].mxu1 %v2177_v16 }
  0xb1   : > { %v1015_v12 = vpop.permute.xlu0 %1014 }
  0xb2   : > { %v1244_v18 = vpop.permute.xlu1 %1243 }
 0x16a   : > { %v808_v32 = vpop.f32.mrb[0].mxu0  ;;  %v2671_v33 = vpop.f32.mrb[0].mxu1 }
 0x16b   : > { %v1127_v34 = vmul.f32 2.0, %v808_v32  ;;  %v810_v35 = vpop.f32.mrb[1].mxu0  ;;  %v2673_v36 = vpop.f32.mrb[1].mxu1 }
 0x16c   : > { %v1128_v37 = vmul.f32 2.0, %v810_v35  ;;  %v812_v38 = vpop.f32.mrb[2].mxu0  ;;  %v2675_v39 = vpop.f32.mrb[2].mxu1  ;;  %v2728_v35 = vrot.slane %v954_v14, %v1059_v23 }
 0x16d   : > { %v1159_v41 = vsub.f32 %v1063_v28, %v1127_v34  ;;  %v1129_v42 = vmul.f32 2.0, %v812_v38  ;;  %v814_v43 = vpop.f32.mrb[3].mxu0  ;;  %v2678_v44 = vpop.f32.mrb[3].mxu1  ;;  %v2724_v34 = vrot.slane %v954_v14, %v1055_v21  ;;  %v1070_v21 = vadd.f32 %v2663_v27, %v2655_v25 }
 0x16e   : > { %v1160_v46 = vsub.f32 %v1064_v31, %v1128_v37  ;;  %v1130_v47 = vmul.f32 2.0, %v814_v43  ;;  %vm1296_vm1 = vcmp.ne.s32.totalorder %v1241_v9, %v2728_v35  ;;  %vm1298_vm3 = vcmp.ne.s32.totalorder %v1244_v18, %v2728_v35 }
 0x16f   : > { %v2681_v48 = vmax.f32 %v1159_v41, 0.0  ;;  %v1161_v49 = vsub.f32 %v1065_v40, %v1129_v42  ;;  %v2738_v41 = vadd.f32 %v2659_v26, %v2666_v29  ;;  %v2742_v42 = vadd.f32 %v2663_v27, %v2666_v29 }
 0x170   : > { %v2683_v50 = vmax.f32 %v1160_v46, 0.0  ;;  %v1162_v51 = vsub.f32 %v1066_v45, %v1130_v47  ;;  %v2748_v45 = vadd.f32 %v2659_v26, %v2668_v30  ;;  %v2752_v46 = vadd.f32 %v2663_v27, %v2668_v30 }
 0x171   : > { %v1455_v53 = vsub.f32 0.0, %v2681_v48  ;;  %v2691_v59 = vmax.f32 %v1161_v49, 0.0  ;;  %vm1295_vm0 = vcmp.ne.s32.totalorder %v1241_v9, %v2724_v34  ;;  %v2756_v29 = vadd.f32 %v2659_v26, %v1005_v57 }
 0x172   : > { %v1456_v54 = vsub.f32 0.0, %v2683_v50  ;;  %v818_v55 = vpop.f32.mrb[4].mxu0  ;;  %v2689_v56 = vpop.f32.mrb[4].mxu1  ;;  %v2693_v61 = vmax.f32 %v1162_v51, 0.0  ;;  %v2770_v30 = vadd.f32 %v2663_v27, %v2685_v52  ;;  %vm1297_vm2 = vcmp.ne.s32.totalorder %v1244_v18, %v2724_v34 }
 0x173   : > { %v1487_v58 = vmul.f32 1.442695, %v1455_v53  ;;  %v1457_v62 = vsub.f32 0.0, %v2691_v59  ;;  %v820_v63 = vpop.f32.mrb[5].mxu0  ;;  %v2696_v0 = vpop.f32.mrb[5].mxu1  ;;  %v1131_v11 = vmul.f32 2.0, %v818_v55  ;;  %v2762_v53 = vadd.f32 %v2663_v27, %v1005_v57 }
 0x174   : > { %v1489_v60 = vmul.f32 1.442695, %v1456_v54  ;;  %v1458_v2 = vsub.f32 0.0, %v2693_v61  ;;  %v822_v3 = vpop.f32.mrb[6].mxu0  ;;  %v2700_v4 = vpop.f32.mrb[6].mxu1  ;;  %v1132_v13 = vmul.f32 2.0, %v820_v63  ;;  %v2766_v54 = vadd.f32 %v2659_v26, %v2685_v52 }
 0x175   : > { %2178 = vpow2.f32 %v1487_v58  ;;  %v1491_v5 = vmul.f32 1.442695, %v1457_v62  ;;  %v824_v6 = vpop.f32.mrb[7].mxu0  ;;  %v2702_v7 = vpop.f32.mrb[7].mxu1  ;;  %v1163_v15 = vsub.f32 %v1067_v1, %v1131_v11  ;;  %v1133_v16 = vmul.f32 2.0, %v822_v3  ;;  %3314 = vst [vmem:[#allocation11_spill] sm:$0xff] %v2762_v53 }
 0x176   : > { %2180 = vpow2.f32 %v1489_v60  ;;  %v1493_v10 = vmul.f32 1.442695, %v1458_v2  ;;  %v1164_v28 = vsub.f32 %v1068_v8, %v1132_v13  ;;  %v1134_v47 = vmul.f32 2.0, %v824_v6  ;;  %3315 = vst [vmem:[#allocation12_spill] sm:$0xff] %v2766_v54  ;;  %3316 = vst [vmem:[#allocation13_spill] sm:$0xff] %v2770_v30  ;;  %v1020_v55 = vpop.permute.xlu0 %1019  ;;  %v1247_v11 = vpop.permute.xlu1 %1246 }
 0x177   : > { %2182 = vpow2.f32 %v1491_v5  ;;  %v2730_v37 = vmax.f32 %v1163_v15, 0.0  ;;  %v1165_v23 = vsub.f32 %v1069_v24, %v1133_v16  ;;  %v3306_v60 = vmov 0.0  }
 0x178   : > { %2184 = vpow2.f32 %v1493_v10  ;;  %v2759_v49 = vmax.f32 %v1164_v28, 0.0  ;;  %v2774_v62 = vsel %vm1295_vm0, 1.0, %v3306_v60  ;;  %v2781_v3 = vadd.f32 %v2659_v26, %v1015_v12 }
 0x179   : > { %v1459_v58 = vsub.f32 0.0, %v2730_v37  ;;  %v2776_v1 = vmax.f32 %v1165_v23, 0.0  ;;  %v2784_v52 = vadd.f32 %v2663_v27, %v1015_v12  ;;  %v2789_v5 = vsel %vm1296_vm1, 1.0, %v3306_v60 }
 0x17a   : > { %v2708_v17 = vpop.f32.mrb[8].mxu0  ;;  %v2710_v19 = vpop.f32.mrb[8].mxu1  ;;  %v1166_v6 = vsub.f32 %v1070_v21, %v1134_v47  ;;  %v1460_v14 = vsub.f32 0.0, %v2759_v49  ;;  %v1391_v16 = vsub.f32 1.0, %v2774_v62  ;;  %vm1299_vm4 = vcmp.ne.s32.totalorder %v1247_v11, %v2724_v34 }
 0x17b   : > { %3310 = vst [vmem:[#allocation7_spill] sm:$0xff] %v2710_v19  ;;  %v2712_v22 = vpop.f32.mrb[9].mxu0  ;;  %v2714_v20 = vpop.f32.mrb[9].mxu1  ;;  %v1495_v9 = vmul.f32 1.442695, %v1459_v58  ;;  %v1461_v23 = vsub.f32 0.0, %v2776_v1  ;;  %vm1300_vm5 = vcmp.ne.s32.totalorder %v1247_v11, %v2728_v35 }
 0x17c   : > { %3311 = vst [vmem:[#allocation8_spill] sm:$0xff] %v2714_v20  ;;  %v2718_v31 = vpop.f32.mrb[10].mxu0  ;;  %v2720_v32 = vpop.f32.mrb[10].mxu1  ;;  %v1979_v58 = vsel %vm1297_vm2, 1.0, %v3306_v60  ;;  %v1143_v53 = vmul.f32 2.0, %v2671_v33 }
 0x17d   : > { %3312 = vst [vmem:[#allocation9_spill] sm:$0xff] %v2720_v32  ;;  %v2732_v38 = vpop.f32.mrb[11].mxu0  ;;  %v2734_v40 = vpop.f32.mrb[11].mxu1  ;;  %v1393_v18 = vsub.f32 1.0, %v1979_v58 }
 0x17e   : > { %3313 = vst [vmem:[#allocation10_spill] sm:$0xff] %v2734_v40  ;;  %v1250_v32 = vpop.permute.xlu1 %1249 }
 0x17f   : > { %v2179_v43 = vpop.eup %2178  ;;  %vm1301_vm6 = vcmp.ne.s32.totalorder %v1250_v32, %v2724_v34  ;;  %vm1302_vm7 = vcmp.ne.s32.totalorder %v1250_v32, %v2728_v35 }
 0x180   : > { %v1551_v25 = vsub.f32 1.01, %v2179_v43  ;;  %v2181_v51 = vpop.eup %2180  ;;  %v2807_v43 = vmax.f32 %v1166_v6, 0.0  ;;  %v2822_v6 = vsel %vm1298_vm3, 1.0, %v3306_v60 }
 0x181   : > { %v1552_v63 = vsub.f32 1.01, %v2181_v51  ;;  %v2183_v2 = vpop.eup %2182  ;;  %v1392_v51 = vsub.f32 1.0, %v2789_v5 }
 0x182   : > { %2186 = vlog2.f32 %v1551_v25  ;;  %v2778_v57 = vpop.f32.mrb[12].mxu0  ;;  %v2791_v8 = vpop.f32.mrb[12].mxu1  ;;  %v1553_v13 = vsub.f32 1.01, %v2183_v2  ;;  %v1135_v2 = vmul.f32 2.0, %v2708_v17 }
 0x183   : > { %3317 = vst [vmem:[#allocation14_spill] sm:$0xff] %v2791_v8  ;;  %v2793_v10 = vpop.f32.mrb[13].mxu0  ;;  %2188 = vlog2.f32 %v1552_v63  ;;  %v2797_v15 = vpop.f32.mrb[13].mxu1  ;;  %v2838_v8 = vsel %vm1300_vm5, 1.0, %v3306_v60 }
 0x184   : > { %3318 = vst [vmem:[#allocation15_spill] sm:$0xff] %v2797_v15  ;;  %v2185_v12 = vpop.eup %2184  ;;  %v2802_v24 = vpop.f32.mrb[14].mxu0  ;;  %2190 = vlog2.f32 %v1553_v13  ;;  %v1497_v13 = vmul.f32 1.442695, %v1460_v14  ;;  %v2834_v15 = vsel %vm1299_vm4, 1.0, %v3306_v60  ;;  %v1167_v17 = vsub.f32 %v2738_v41, %v1135_v2 }
 0x185   : > { %3319 = vst [vmem:[#allocation16_spill] sm:$0xff] %v2802_v24  ;;  %v2804_v28 = vpop.f32.mrb[14].mxu1  ;;  %v1554_v21 = vsub.f32 1.01, %v2185_v12  ;;  %v2809_v47 = vpop.f32.mrb[15].mxu0  ;;  %v1462_v12 = vsub.f32 0.0, %v2807_v43  ;;  %v1424_v24 = vmul.f32 %v1392_v51, %v2683_v50 }
 0x186   : > { %3320 = vst [vmem:[#allocation17_spill] sm:$0xff] %v2804_v28  ;;  %3321 = vst [vmem:[#allocation18_spill] sm:$0xff] %v2809_v47  ;;  %v2811_v25 = vpop.f32.mrb[15].mxu1  ;;  %v1025_v63 = vpop.permute.xlu0 %1024  ;;  %v2829_v28 = vadd.f32 %v2663_v27, %v1020_v55  ;;  %v1499_v14 = vmul.f32 1.442695, %v1461_v23  ;;  %v2847_v11 = vmax.f32 %v1167_v17, 0.0 }
 0x187   : > { %3322 = vst [vmem:[#allocation19_spill] sm:$0xff] %v2811_v25  ;;  %2192 = vlog2.f32 %v1554_v21  ;;  %v2826_v25 = vadd.f32 %v2659_v26, %v1020_v55  ;;  %v2841_v21 = vadd.f32 %v2659_v26, %v1025_v63  ;;  %v2844_v40 = vadd.f32 %v2663_v27, %v1025_v63 }
 0x188   : > { %2194 = vpow2.f32 %v1495_v9  ;;  %v1394_v55 = vsub.f32 1.0, %v2822_v6  ;;  %v1501_v2 = vmul.f32 1.442695, %v1462_v12  ;;  %v1136_v60 = vmul.f32 2.0, %v2712_v22 }
 0x189   : > { %2196 = vpow2.f32 %v1497_v13  ;;  %v1463_v63 = vsub.f32 0.0, %v2847_v11  ;;  %v1423_v22 = vmul.f32 %v1391_v16, %v2681_v48 }
 0x18a   : > { %v1030_v9 = vpop.permute.xlu0 %1029  ;;  %2198 = vpow2.f32 %v1499_v14  ;;  %v1426_v51 = vmul.f32 %v1394_v55, %v2693_v61 }
 0x18b   : > { %v2855_v47 = vadd.f32 %v2659_v26, %v1030_v9  ;;  %v2858_v17 = vadd.f32 %v2663_v27, %v1030_v9  ;;  %v1503_v23 = vmul.f32 1.442695, %v1463_v63  ;;  %2200 = vpow2.f32 %v1501_v2  ;;  %v1253_v9 = vpop.permute.xlu1 %1252 }
 0x18c   : > { %v2187_v30 = vpop.eup %2186  ;;  %vm1303_vm8 = vcmp.ne.s32.totalorder %v1253_v9, %v2724_v34  ;;  %vm1304_vm9 = vcmp.ne.s32.totalorder %v1253_v9, %v2728_v35 }
 0x18d   : > { %v1584_v20 = vmul.f32 0.6931472, %v2187_v30  ;;  %v2189_v19 = vpop.eup %2188  ;;  %3323 = vst [vmem:[#allocation20_spill] sm:$0xff] %v2855_v47  ;;  %3324 = vst [vmem:[#allocation21_spill] sm:$0xff] %v2858_v17  ;;  %v3325_v30 = vmov 0.0   ;;  %v1168_v47 = vsub.f32 %v2742_v42, %v1136_v60  ;;  %2202 = vpow2.f32 %v1503_v23 }
 0x18e   : > { %v1586_v12 = vmul.f32 0.6931472, %v2189_v19  ;;  %v2191_v41 = vpop.eup %2190  ;;  %v2864_v54 = vsel %vm1301_vm6, 1.0, %v3325_v30  ;;  %v2873_v19 = vsel %vm1302_vm7, 1.0, %v3325_v30  ;;  %v2893_v61 = vsel %vm1304_vm9, 1.0, %v3325_v30 }
 0x18f   : > { %v1647_v13 = vmul.f32 %v2774_v62, %v1584_v20  ;;  %v1588_v48 = vmul.f32 0.6931472, %v2191_v41  ;;  %v1425_v20 = vmul.f32 %v1393_v18, %v2691_v59  ;;  %v1397_v62 = vsub.f32 1.0, %v2864_v54  ;;  %v1035_v41 = vpop.permute.xlu0 %1034 }
 0x190   : > { %v1648_v14 = vmul.f32 %v2789_v5, %v1586_v12  ;;  %v1175_v5 = vsub.f32 %v2781_v3, %v1143_v53  ;;  %v2881_v32 = vmax.f32 %v1168_v47, 0.0  ;;  %v1398_v59 = vsub.f32 1.0, %v2873_v19  ;;  %v1256_v3 = vpop.permute.xlu1 %1255 }
 0x191   : > { %v1679_v17 = vsub.f32 %v1423_v22, %v1647_v13  ;;  %v2193_v16 = vpop.eup %2192  ;;  %v1649_v42 = vmul.f32 %v1979_v58, %v1588_v48  ;;  %v2888_v58 = vsel %vm1303_vm8, 1.0, %v3325_v30  ;;  %v1137_v53 = vmul.f32 2.0, %v2718_v31 }
 0x192   : > { %v1680_v33 = vsub.f32 %v1424_v24, %v1648_v14  ;;  %v1590_v60 = vmul.f32 0.6931472, %v2193_v16  ;;  %v2195_v50 = vpop.eup %2194  ;;  %vm1305_vm10 = vcmp.ne.s32.totalorder %v1256_v3, %v2724_v34  ;;  %vm1306_vm11 = vcmp.ne.s32.totalorder %v1256_v3, %v2728_v35 }
 0x193   : > { %v1681_v63 = vsub.f32 %v1425_v20, %v1649_v42  ;;  %v1555_v23 = vsub.f32 1.01, %v2195_v50  ;;  %v2197_v24 = vpop.eup %2196  ;;  %v1144_v13 = vmul.f32 2.0, %v2673_v36  ;;  %v1464_v31 = vsub.f32 0.0, %v2881_v32  ;;  %v1040_v42 = vpop.permute.xlu0 %1039 }
 0x194   : > { %v1711_v2 = vadd.f32 %v1680_v33, %v1679_v17  ;;  %v1650_v22 = vmul.f32 %v2822_v6, %v1590_v60  ;;  %v1556_v6 = vsub.f32 1.01, %v2197_v24  ;;  %v2199_v55 = vpop.eup %2198  ;;  %v2898_v17 = vmax.f32 %v1175_v5, 0.0 }
 0x195   : > { %2204 = vlog2.f32 %v1555_v23  ;;  %v1557_v9 = vsub.f32 1.01, %v2199_v55  ;;  %v2201_v14 = vpop.eup %2200  ;;  %v2905_v48 = vadd.f32 %v2659_v26, %v1035_v41  ;;  %v2908_v16 = vadd.f32 %v2663_v27, %v1035_v41 }
 0x196   : > { %v1712_v47 = vadd.f32 %v1711_v2, %v1681_v63  ;;  %v1682_v18 = vsub.f32 %v1426_v51, %v1650_v22  ;;  %2206 = vlog2.f32 %v1556_v6  ;;  %v1399_v33 = vsub.f32 1.0, %v2888_v58 }
 0x197   : > { %v1169_v20 = vsub.f32 %v2748_v45, %v1137_v53  ;;  %v2914_v60 = vsel %vm1305_vm10, 1.0, %v3325_v30  ;;  %2208 = vlog2.f32 %v1557_v9  ;;  %v1558_v50 = vsub.f32 1.01, %v2201_v14  ;;  %v2203_v5 = vpop.eup %2202 }
 0x198   : > { %v2901_v12 = vadd.f32 %v1712_v47, %v1682_v18  ;;  %v2919_v51 = vsel %vm1306_vm11, 1.0, %v3325_v30  ;;  %v1176_v41 = vsub.f32 %v2784_v52, %v1144_v13  ;;  %v1138_v45 = vmul.f32 2.0, %v2732_v38  ;;  %v1259_v47 = vpop.permute.xlu1 %1258 }
 0x199   : > { %v2922_v2 = vmax.f32 %v1169_v20, 0.0  ;;  %v1471_v63 = vsub.f32 0.0, %v2898_v17  ;;  %2210 = vlog2.f32 %v1558_v50  ;;  %v1559_v22 = vsub.f32 1.01, %v2203_v5 }
 0x19a   : > { %v1505_v23 = vmul.f32 1.442695, %v1464_v31  ;;  %v2927_v24 = vadd.f32 %v2659_v26, %v1040_v42  ;;  %v2930_v53 = vadd.f32 %v2663_v27, %v1040_v42  ;;  %vm1307_vm12 = vcmp.ne.s32.totalorder %v1259_v47, %v2724_v34  ;;  %v1045_v31 = vpop.permute.xlu0 %1044 }
 0x19b   : > { %v1465_v52 = vsub.f32 0.0, %v2922_v2  ;;  %v1145_v38 = vmul.f32 2.0, %v2675_v39  ;;  %2212 = vlog2.f32 %v1559_v22  ;;  %v1170_v18 = vsub.f32 %v2752_v46, %v1138_v45 }
 0x19c   : > { %vm1308_vm13 = vcmp.ne.s32.totalorder %v1259_v47, %v2728_v35  ;;  %v1146_v55 = vmul.f32 2.0, %v2678_v44  ;;  %v1519_v14 = vmul.f32 1.442695, %v1471_v63  ;;  %v2940_v20 = vmax.f32 %v1176_v41, 0.0 }
 0x19d   : > { %v1507_v13 = vmul.f32 1.442695, %v1465_v52  ;;  %2214 = vpow2.f32 %v1505_v23  ;;  %v2942_v42 = vmax.f32 %v1170_v18, 0.0  ;;  %v2945_v39 = vadd.f32 %v2659_v26, %v1045_v31 }
 0x19e   : > { %v2948_v46 = vadd.f32 %v2663_v27, %v1045_v31  ;;  %v2953_v50 = vsel %vm1307_vm12, 1.0, %v3325_v30  ;;  %v2956_v45 = vsel %vm1308_vm13, 1.0, %v3325_v30  ;;  %v1177_v41 = vsub.f32 %v2826_v25, %v1145_v38 }
 0x19f   : > { %v2205_v9 = vpop.eup %2204  ;;  %2216 = vpow2.f32 %v1507_v13  ;;  %v1466_v63 = vsub.f32 0.0, %v2942_v42  ;;  %v1178_v22 = vsub.f32 %v2829_v28, %v1146_v55  ;;  %v3326_v23 = vsub.f32 1.0, %v2834_v15 }
 0x1a0   : > { %v1592_v44 = vmul.f32 0.6931472, %v2205_v9  ;;  %v2207_v5 = vpop.eup %2206  ;;  %2218 = vpow2.f32 %v1519_v14  ;;  %v1472_v9 = vsub.f32 0.0, %v2940_v20  ;;  %v1147_v6 = vmul.f32 2.0, %v2689_v56 }
 0x1a1   : > { %v1427_v52 = vmul.f32 %v3326_v23, %v2730_v37  ;;  %v1594_v18 = vmul.f32 0.6931472, %v2207_v5  ;;  %v2209_v31 = vpop.eup %2208  ;;  %v1509_v3 = vmul.f32 1.442695, %v1466_v63  ;;  %v3327_v38 = vsub.f32 1.0, %v2838_v8 }
 0x1a2   : > { %v1651_v47 = vmul.f32 %v2834_v15, %v1592_v44  ;;  %v1596_v55 = vmul.f32 0.6931472, %v2209_v31  ;;  %v2971_v37 = vmax.f32 %v1177_v41, 0.0  ;;  %v1429_v15 = vmul.f32 %v1397_v62, %v2776_v1 }
 0x1a3   : > { %v1428_v13 = vmul.f32 %v3327_v38, %v2759_v49  ;;  %v1652_v28 = vmul.f32 %v2838_v8, %v1594_v18  ;;  %v2211_v36 = vpop.eup %2210  ;;  %2220 = vpow2.f32 %v1509_v3  ;;  %v1139_v14 = vmul.f32 2.0, %v2778_v57 }
 0x1a4   : > { %v1683_v25 = vsub.f32 %v1427_v52, %v1651_v47  ;;  %v1653_v5 = vmul.f32 %v2864_v54, %v1596_v55  ;;  %v1598_v63 = vmul.f32 0.6931472, %v2211_v36  ;;  %v1521_v23 = vmul.f32 1.442695, %v1472_v9 }
 0x1a5   : > { %v1684_v44 = vsub.f32 %v1428_v13, %v1652_v28  ;;  %v2213_v49 = vpop.eup %2212  ;;  %v1179_v8 = vsub.f32 %v2841_v21, %v1147_v6  ;;  %v1148_v41 = vmul.f32 2.0, %v2696_v0  ;;  %v1430_v52 = vmul.f32 %v1398_v59, %v2807_v43 }
 0x1a6   : > { %v1714_v56 = vadd.f32 %v2901_v12, %v1683_v25  ;;  %v1685_v62 = vsub.f32 %v1429_v15, %v1653_v5  ;;  %v1654_v57 = vmul.f32 %v2873_v19, %v1598_v63  ;;  %v1600_v3 = vmul.f32 0.6931472, %v2213_v49  ;;  %v3329_v5 = vld [vmem:[#allocation20_spill] sm:$0xff]  ;;  %v3330_v49 = vld [vmem:[#allocation21_spill] sm:$0xff] }
 0x1a7   : > { %v2215_v12 = vpop.eup %2214  ;;  %v1473_v47 = vsub.f32 0.0, %v2971_v37  ;;  %v2986_v54 = vmax.f32 %v1178_v22, 0.0  ;;  %v1431_v21 = vmul.f32 %v1399_v33, %v2847_v11  ;;  %v1171_v0 = vsub.f32 %v2756_v29, %v1139_v14 }
 0x1a8   : > { %v1715_v1 = vadd.f32 %v1714_v56, %v1684_v44  ;;  %v1686_v6 = vsub.f32 %v1430_v52, %v1654_v57  ;;  %v1655_v43 = vmul.f32 %v2888_v58, %v1600_v3  ;;  %v1560_v59 = vsub.f32 1.01, %v2215_v12  ;;  %v3332_v57 = vld [vmem:[#allocation12_spill] sm:$0xff] }
 0x1a9   : > { %v2217_v18 = vpop.eup %2216  ;;  %v2993_v31 = vmax.f32 %v1179_v8, 0.0  ;;  %v1180_v19 = vsub.f32 %v2844_v40, %v1148_v41  ;;  %v1149_v9 = vmul.f32 2.0, %v2700_v4  ;;  %v1150_v22 = vmul.f32 2.0, %v2702_v7  ;;  %v3328_v4 = vld [vmem:[#allocation16_spill] sm:$0xff]  ;;  %v3331_v41 = vld [vmem:[#allocation11_spill] sm:$0xff] }
 0x1aa   : > { %v1716_v36 = vadd.f32 %v1715_v1, %v1685_v62  ;;  %v1687_v38 = vsub.f32 %v1431_v21, %v1655_v43  ;;  %2222 = vlog2.f32 %v1560_v59  ;;  %v1561_v11 = vsub.f32 1.01, %v2217_v18  ;;  %v2219_v33 = vpop.eup %2218 }
 0x1ab   : > { %v1523_v29 = vmul.f32 1.442695, %v1473_v47  ;;  %v1474_v13 = vsub.f32 0.0, %v2986_v54  ;;  %v2999_v28 = vmax.f32 %v1171_v0, 0.0  ;;  %v1140_v58 = vmul.f32 2.0, %v2793_v10 }
 0x1ac   : > { %v1717_v25 = vadd.f32 %v1716_v36, %v1686_v6  ;;  %v1403_v55 = vsub.f32 1.0, %v2953_v50  ;;  %2224 = vlog2.f32 %v1561_v11  ;;  %v1141_v40 = vmul.f32 2.0, %v3328_v4  ;;  %v1050_v6 = vpop.permute.xlu0 %1049 }
 0x1ad   : > { %v2221_v7 = vpop.eup %2220  ;;  %2226 = vpow2.f32 %v1521_v23  ;;  %v1475_v14 = vsub.f32 0.0, %v2993_v31  ;;  %v3007_v56 = vmax.f32 %v1180_v19, 0.0  ;;  %v1467_v44 = vsub.f32 0.0, %v2999_v28  ;;  %v3333_v19 = vld [vmem:[#allocation18_spill] sm:$0xff] }
 0x1ae   : > { %v3003_v15 = vadd.f32 %v1717_v25, %v1687_v38  ;;  %v1181_v63 = vsub.f32 %v3329_v5, %v1149_v9  ;;  %v1182_v8 = vsub.f32 %v3330_v49, %v1150_v22  ;;  %v1562_v10 = vsub.f32 1.01, %v2221_v7  ;;  %v3334_v25 = vld [vmem:[#allocation7_spill] sm:$0xff] }
 0x1af   : > { %v1172_v52 = vsub.f32 %v3331_v41, %v1140_v58  ;;  %2228 = vpow2.f32 %v1523_v29  ;;  %v1525_v1 = vmul.f32 1.442695, %v1474_v13  ;;  %v1511_v62 = vmul.f32 1.442695, %v1467_v44  ;;  %v3335_v13 = vld [vmem:[#allocation8_spill] sm:$0xff] }
 0x1b0   : > { %v1173_v3 = vsub.f32 %v3332_v57, %v1141_v40  ;;  %v1404_v23 = vsub.f32 1.0, %v2956_v45  ;;  %v1567_v12 = vsub.f32 1.01, %v2219_v33  ;;  %2230 = vlog2.f32 %v1562_v10 }
 0x1b1   : > { %v3015_v47 = vmax.f32 %v1172_v52, 0.0  ;;  %v1527_v21 = vmul.f32 1.442695, %v1475_v14  ;;  %v1476_v0 = vsub.f32 0.0, %v3007_v56  ;;  %2232 = vpow2.f32 %v1511_v62  ;;  %v3336_v14 = vld [vmem:[#allocation13_spill] sm:$0xff] }
 0x1b2   : > { %v3018_v36 = vmax.f32 %v1173_v3, 0.0  ;;  %v3020_v43 = vmax.f32 %v1181_v63, 0.0  ;;  %v3022_v59 = vmax.f32 %v1182_v8, 0.0  ;;  %v1142_v9 = vmul.f32 2.0, %v3333_v19  ;;  %v3338_v3 = vld [vmem:[#allocation9_spill] sm:$0xff] }
 0x1b3   : > { %v1468_v18 = vsub.f32 0.0, %v3015_v47  ;;  %v3027_v22 = vadd.f32 %v2659_v26, %v1050_v6  ;;  %2234 = vpow2.f32 %v1525_v1  ;;  %v1151_v38 = vmul.f32 2.0, %v3334_v25  ;;  %v3340_v25 = vld [vmem:[#allocation10_spill] sm:$0xff] }
 0x1b4   : > { %v1469_v11 = vsub.f32 0.0, %v3018_v36  ;;  %v2223_v33 = vpop.eup %2222  ;;  %v3032_v29 = vadd.f32 %v2663_v27, %v1050_v6  ;;  %2236 = vlog2.f32 %v1567_v12  ;;  %v1152_v58 = vmul.f32 2.0, %v3335_v13  ;;  %v1262_v27 = vpop.permute.xlu1 %1261 }
 0x1b5   : > { %v1513_v4 = vmul.f32 1.442695, %v1468_v18  ;;  %2238 = vpow2.f32 %v1527_v21  ;;  %v1602_v40 = vmul.f32 0.6931472, %v2223_v33  ;;  %v1174_v44 = vsub.f32 %v3336_v14, %v1142_v9 }
 0x1b6   : > { %v1515_v7 = vmul.f32 1.442695, %v1469_v11  ;;  %v2225_v26 = vpop.eup %2224  ;;  %v1529_v5 = vmul.f32 1.442695, %v1476_v0  ;;  %v1477_v63 = vsub.f32 0.0, %v3020_v43  ;;  %v1478_v49 = vsub.f32 0.0, %v3022_v59 }
 0x1b7   : > { %2240 = vpow2.f32 %v1513_v4  ;;  %v3038_v8 = vpop.eup %2226  ;;  %v1183_v10 = vsub.f32 %v2905_v48, %v1151_v38  ;;  %v3337_v41 = vsub.f32 1.0, %v2893_v61  ;;  %v1656_v1 = vmul.f32 %v2893_v61, %v1602_v40  ;;  %v3341_v40 = vld [vmem:[#allocation14_spill] sm:$0xff] }
 0x1b8   : > { %v1604_v62 = vmul.f32 0.6931472, %v2225_v26  ;;  %vm1309_vm14 = vcmp.ne.s32.totalorder %v1262_v27, %v2724_v34  ;;  %v1184_v57 = vsub.f32 %v2908_v16, %v1152_v58  ;;  %v1153_v12 = vmul.f32 2.0, %v3338_v3 }
 0x1b9   : > { %v1432_v52 = vmul.f32 %v3337_v41, %v2881_v32  ;;  %2242 = vpow2.f32 %v1515_v7  ;;  %v3048_v21 = vpop.eup %2228  ;;  %v3339_v48 = vsub.f32 1.0, %v2914_v60  ;;  %v3054_v32 = vmax.f32 %v1174_v44, 0.0 }
 0x1ba   : > { %v1657_v18 = vmul.f32 %v2914_v60, %v1604_v62  ;;  %v2231_v61 = vpop.eup %2230  ;;  %2244 = vpow2.f32 %v1529_v5  ;;  %v1531_v19 = vmul.f32 1.442695, %v1477_v63  ;;  %v1533_v9 = vmul.f32 1.442695, %v1478_v49 }
 0x1bb   : > { %v1688_v0 = vsub.f32 %v1432_v52, %v1656_v1  ;;  %v1433_v6 = vmul.f32 %v3339_v48, %v2922_v2  ;;  %v1154_v16 = vmul.f32 2.0, %v3340_v25  ;;  %v2233_v38 = vpop.eup %2232  ;;  %v3057_v11 = vmax.f32 %v1183_v10, 0.0  ;;  %v3343_v10 = vld [vmem:[#allocation15_spill] sm:$0xff] }
 0x1bc   : > { %v1606_v58 = vmul.f32 0.6931472, %v2231_v61  ;;  %v1185_v4 = vsub.f32 %v2927_v24, %v1153_v12  ;;  %v1563_v2 = vsub.f32 1.01, %v2233_v38  ;;  %v1155_v60 = vmul.f32 2.0, %v3341_v40  ;;  %v3344_v12 = vld [vmem:[#allocation17_spill] sm:$0xff] }
 0x1bd   : > { %v1719_v33 = vadd.f32 %v3003_v15, %v1688_v0  ;;  %v1689_v13 = vsub.f32 %v1433_v6, %v1657_v18  ;;  %v1470_v7 = vsub.f32 0.0, %v3054_v32  ;;  %v3063_v14 = vpop.eup %2234  ;;  %v3065_v44 = vmax.f32 %v1184_v57, 0.0 }
 0x1be   : > { %v3342_v5 = vsub.f32 1.0, %v2919_v51  ;;  %v1658_v15 = vmul.f32 %v2919_v51, %v1606_v58  ;;  %v3071_v49 = vpop.eup %2236  ;;  %v1186_v24 = vsub.f32 %v2930_v53, %v1154_v16  ;;  %2246 = vlog2.f32 %v1563_v2  ;;  %v1265_v58 = vpop.permute.xlu0 %1264 }
 0x1bf   : > { %v1720_v26 = vadd.f32 %v1719_v33, %v1689_v13  ;;  %v1156_v41 = vmul.f32 2.0, %v3343_v10  ;;  %v1517_v52 = vmul.f32 1.442695, %v1470_v7  ;;  %v3075_v1 = vpop.eup %2238  ;;  %vm1310_vm15 = vcmp.ne.s32.totalorder %v1262_v27, %v2728_v35 }
 0x1c0   : > { %v1434_v63 = vmul.f32 %v3342_v5, %v2942_v42  ;;  %2248 = vpow2.f32 %v1531_v19  ;;  %v1479_v62 = vsub.f32 0.0, %v3057_v11  ;;  %v3079_v42 = vmax.f32 %v1185_v4, 0.0 }
 0x1c1   : > { %v2241_v3 = vpop.eup %2240  ;;  %v1187_v51 = vsub.f32 %v2945_v39, %v1155_v60  ;;  %v1157_v0 = vmul.f32 2.0, %v3344_v12  ;;  %2250 = vpow2.f32 %v1517_v52  ;;  %v3086_v53 = vsel %vm1309_vm14, 1.0, %v3325_v30  ;;  %v3345_v39 = vld [vmem:[#allocation19_spill] sm:$0xff] }
 0x1c2   : > { %v1690_v57 = vsub.f32 %v1434_v63, %v1658_v15  ;;  %2252 = vpow2.f32 %v1533_v9  ;;  %v1564_v6 = vsub.f32 1.01, %v2241_v3  ;;  %v1480_v61 = vsub.f32 0.0, %v3065_v44 }
 0x1c3   : > { %v2243_v18 = vpop.eup %2242  ;;  %v3091_v19 = vmax.f32 %v1186_v24, 0.0  ;;  %v1188_v25 = vsub.f32 %v2948_v46, %v1156_v41  ;;  %v1158_v16 = vmul.f32 2.0, %v3345_v39  ;;  %v3098_v38 = vsel %vm1310_vm15, 1.0, %v3325_v30 }
 0x1c4   : > { %v3088_v48 = vadd.f32 %v1720_v26, %v1690_v57  ;;  %v1568_v33 = vsub.f32 1.01, %v3038_v8  ;;  %2254 = vlog2.f32 %v1564_v6  ;;  %v1565_v9 = vsub.f32 1.01, %v2243_v18  ;;  %v3101_v13 = vpop.eup %2244  ;;  %v1268_v8 = vpop.permute.xlu1 %1267 }
 0x1c5   : > { %v1535_v4 = vmul.f32 1.442695, %v1479_v62  ;;  %v1481_v2 = vsub.f32 0.0, %v3079_v42  ;;  %v3104_v40 = vmax.f32 %v1187_v51, 0.0  ;;  %v1189_v46 = vsub.f32 %v3027_v22, %v1157_v0 }
 0x1c6   : > { %vm1311_vm0 = vcmp.ne.s32.totalorder %v1265_v58, %v2724_v34  ;;  %v1405_v27 = vsub.f32 1.0, %v3086_v53  ;;  %v1569_v60 = vsub.f32 1.01, %v3048_v21  ;;  %2256 = vlog2.f32 %v1565_v9 }
 0x1c7   : > { %v1537_v7 = vmul.f32 1.442695, %v1480_v61  ;;  %v1482_v26 = vsub.f32 0.0, %v3091_v19  ;;  %v3111_v5 = vmax.f32 %v1188_v25, 0.0  ;;  %v1190_v63 = vsub.f32 %v3032_v29, %v1158_v16 }
 0x1c8   : > { %vm1312_vm1 = vcmp.ne.s32.totalorder %v1265_v58, %v2728_v35  ;;  %v1406_v15 = vsub.f32 1.0, %v3098_v38  ;;  %vm1313_vm2 = vcmp.ne.s32.totalorder %v1268_v8, %v2724_v34  ;;  %2258 = vlog2.f32 %v1568_v33  ;;  %v2247_v22 = vpop.eup %2246 }
 0x1c9   : > { %2260 = vpow2.f32 %v1535_v4  ;;  %v1539_v24 = vmul.f32 1.442695, %v1481_v2  ;;  %v1483_v21 = vsub.f32 0.0, %v3104_v40  ;;  %v3118_v10 = vmax.f32 %v1189_v46, 0.0 }
 0x1ca   : > { %v2249_v41 = vpop.eup %2248  ;;  %v3123_v52 = vsel %vm1311_vm0, 1.0, %v3325_v30  ;;  %vm1314_vm3 = vcmp.ne.s32.totalorder %v1268_v8, %v2728_v35  ;;  %2262 = vlog2.f32 %v1569_v60  ;;  %v1608_v29 = vmul.f32 0.6931472, %v2247_v22 }
 0x1cb   : > { %v2251_v62 = vpop.eup %2250  ;;  %2264 = vpow2.f32 %v1537_v7  ;;  %v1541_v57 = vmul.f32 1.442695, %v1482_v26  ;;  %v1484_v3 = vsub.f32 0.0, %v3111_v5  ;;  %v3127_v51 = vmax.f32 %v1190_v63, 0.0 }
 0x1cc   : > { %v2253_v12 = vpop.eup %2252  ;;  %v1570_v0 = vsub.f32 1.01, %v3063_v14  ;;  %v1435_v6 = vmul.f32 %v1403_v55, %v2999_v28  ;;  %v1659_v18 = vmul.f32 %v2953_v50, %v1608_v29  ;;  %v1566_v61 = vsub.f32 1.01, %v2251_v62 }
 0x1cd   : > { %v3137_v25 = vsel %vm1312_vm1, 1.0, %v3325_v30  ;;  %2266 = vpow2.f32 %v1539_v24  ;;  %v1543_v39 = vmul.f32 1.442695, %v1483_v21  ;;  %v1485_v16 = vsub.f32 0.0, %v3118_v10 }
 0x1ce   : > { %v2255_v33 = vpop.eup %2254  ;;  %v3143_v14 = vsel %vm1313_vm2, 1.0, %v3325_v30  ;;  %v1571_v28 = vsub.f32 1.01, %v3075_v1  ;;  %v1691_v55 = vsub.f32 %v1435_v6, %v1659_v18  ;;  %2268 = vlog2.f32 %v1566_v61 }
 0x1cf   : > { %2270 = vpow2.f32 %v1541_v57  ;;  %v1610_v50 = vmul.f32 0.6931472, %v2255_v33  ;;  %v1545_v9 = vmul.f32 1.442695, %v1484_v3  ;;  %v1486_v58 = vsub.f32 0.0, %v3127_v51  ;;  %v1271_v57 = vpop.permute.xlu0 %1270 }
 0x1d0   : > { %v2257_v4 = vpop.eup %2256  ;;  %2272 = vlog2.f32 %v1570_v0  ;;  %v1572_v2 = vsub.f32 1.01, %v3101_v13  ;;  %v1722_v46 = vadd.f32 %v3088_v48, %v1691_v55  ;;  %v1436_v60 = vmul.f32 %v1404_v23, %v3015_v47 }
 0x1d1   : > { %2274 = vpow2.f32 %v1543_v39  ;;  %v1660_v1 = vmul.f32 %v2956_v45, %v1610_v50  ;;  %v1612_v7 = vmul.f32 0.6931472, %v2257_v4  ;;  %v1547_v26 = vmul.f32 1.442695, %v1485_v16 }
 0x1d2   : > { %v2259_v63 = vpop.eup %2258  ;;  %v3156_v22 = vsel %vm1314_vm3, 1.0, %v3325_v30  ;;  %2276 = vlog2.f32 %v1571_v28  ;;  %v1573_v24 = vsub.f32 1.01, %v2249_v41  ;;  %v1437_v13 = vmul.f32 %v1405_v27, %v3018_v36  ;;  %v1274_v41 = vpop.permute.xlu1 %1273 }
 0x1d3   : > { %v2261_v48 = vpop.eup %2260  ;;  %v1692_v21 = vsub.f32 %v1436_v60, %v1660_v1  ;;  %2278 = vpow2.f32 %v1545_v9  ;;  %v1661_v23 = vmul.f32 %v3086_v53, %v1612_v7  ;;  %v1549_v47 = vmul.f32 1.442695, %v1486_v58 }
 0x1d4   : > { %v2263_v29 = vpop.eup %2262  ;;  %v1407_v45 = vsub.f32 1.0, %v3123_v52  ;;  %v1408_v62 = vsub.f32 1.0, %v3137_v25  ;;  %2280 = vlog2.f32 %v1572_v2  ;;  %v1574_v8 = vsub.f32 1.01, %v2253_v12 }
 0x1d5   : > { %v2265_v3 = vpop.eup %2264  ;;  %vm1315_vm4 = vcmp.ne.s32.totalorder %v1271_v57, %v2724_v34  ;;  %v1723_v0 = vadd.f32 %v1722_v46, %v1692_v21  ;;  %v1693_v36 = vsub.f32 %v1437_v13, %v1661_v23  ;;  %2282 = vpow2.f32 %v1547_v26 }
 0x1d6   : > { %vm1316_vm5 = vcmp.ne.s32.totalorder %v1271_v57, %v2728_v35  ;;  %vm1317_vm6 = vcmp.ne.s32.totalorder %v1274_v41, %v2724_v34  ;;  %2284 = vlog2.f32 %v1573_v24  ;;  %v1575_v53 = vsub.f32 1.01, %v2261_v48 }
 0x1d7   : > { %v2267_v27 = vpop.eup %2266  ;;  %vm1318_vm7 = vcmp.ne.s32.totalorder %v1274_v41, %v2728_v35  ;;  %v1616_v6 = vmul.f32 0.6931472, %v3071_v49  ;;  %v1724_v18 = vadd.f32 %v1723_v0, %v1693_v36  ;;  %2286 = vpow2.f32 %v1549_v47 }
 0x1d8   : > { %v2269_v12 = vpop.eup %2268  ;;  %v1409_v61 = vsub.f32 1.0, %v3143_v14  ;;  %v1410_v39 = vsub.f32 1.0, %v3156_v22  ;;  %2288 = vlog2.f32 %v1574_v8  ;;  %v1576_v16 = vsub.f32 1.01, %v2265_v3 }
 0x1d9   : > { %v2271_v33 = vpop.eup %2270  ;;  %v1997_v28 = vsel %vm1315_vm4, 1.0, %v3325_v30  ;;  %v3175_v55 = vsel %vm1316_vm5, 1.0, %v3325_v30  ;;  %v1618_v49 = vmul.f32 0.6931472, %v2259_v63  ;;  %v1614_v50 = vmul.f32 0.6931472, %v2269_v12 }
 0x1da   : > { %v2273_v9 = vpop.eup %2272  ;;  %v3180_v58 = vsel %vm1317_vm6, 1.0, %v3325_v30  ;;  %v3185_v4 = vsel %vm1318_vm7, 1.0, %v3325_v30  ;;  %2290 = vlog2.f32 %v1575_v53  ;;  %v1577_v2 = vsub.f32 1.01, %v2267_v27 }
 0x1db   : > { %v2275_v46 = vpop.eup %2274  ;;  %v1663_v60 = vmul.f32 %v3123_v52, %v1616_v6  ;;  %v1620_v1 = vmul.f32 0.6931472, %v2263_v29  ;;  %v1438_v7 = vmul.f32 %v1406_v15, %v3054_v32  ;;  %v1662_v26 = vmul.f32 %v3098_v38, %v1614_v50  ;;  %v1277_v6 = vpop.permute.xlu0 %1276 }
 0x1dc   : > { %v2277_v63 = vpop.eup %2276  ;;  %v1411_v24 = vsub.f32 1.0, %v1997_v28  ;;  %v1412_v13 = vsub.f32 1.0, %v3175_v55  ;;  %2292 = vlog2.f32 %v1576_v16  ;;  %v1578_v48 = vsub.f32 1.01, %v2271_v33 }
 0x1dd   : > { %v2279_v21 = vpop.eup %2278  ;;  %v1439_v23 = vmul.f32 %v1407_v45, %v2898_v17  ;;  %v1664_v47 = vmul.f32 %v3137_v25, %v1618_v49  ;;  %v1622_v57 = vmul.f32 0.6931472, %v2273_v9  ;;  %v1694_v52 = vsub.f32 %v1438_v7, %v1662_v26 }
 0x1de   : > { %v2281_v29 = vpop.eup %2280  ;;  %v1413_v8 = vsub.f32 1.0, %v3180_v58  ;;  %v1440_v32 = vmul.f32 %v1408_v62, %v2940_v20  ;;  %2294 = vlog2.f32 %v1577_v2  ;;  %v1579_v38 = vsub.f32 1.01, %v2275_v46 }
 0x1df   : > { %v2283_v15 = vpop.eup %2282  ;;  %v1695_v3 = vsub.f32 %v1439_v23, %v1663_v60  ;;  %v1665_v41 = vmul.f32 %v3143_v14, %v1620_v1  ;;  %v1624_v0 = vmul.f32 0.6931472, %v2277_v63  ;;  %v1725_v36 = vadd.f32 %v1724_v18, %v1694_v52  ;;  %v1280_v60 = vpop.permute.xlu1 %1279 }
 0x1e0   : > { %v2285_v53 = vpop.eup %2284  ;;  %v1414_v17 = vsub.f32 1.0, %v3185_v4  ;;  %v1441_v25 = vmul.f32 %v1409_v61, %v2971_v37  ;;  %2296 = vlog2.f32 %v1578_v48  ;;  %v1580_v45 = vsub.f32 1.01, %v2279_v21  ;;  %v1283_v63 = vpop.permute.xlu0 %1282 }
 0x1e1   : > { %v2287_v27 = vpop.eup %2286  ;;  %v1696_v12 = vsub.f32 %v1440_v32, %v1664_v47  ;;  %v1666_v20 = vmul.f32 %v3156_v22, %v1622_v57  ;;  %v1626_v62 = vmul.f32 0.6931472, %v2281_v29  ;;  %v1726_v16 = vadd.f32 %v1725_v36, %v1695_v3 }
 0x1e2   : > { %v2289_v33 = vpop.eup %2288  ;;  %vm1319_vm8 = vcmp.ne.s32.totalorder %v1277_v6, %v2724_v34  ;;  %v1442_v14 = vmul.f32 %v1410_v39, %v2986_v54  ;;  %2298 = vlog2.f32 %v1579_v38  ;;  %v1581_v18 = vsub.f32 1.01, %v2283_v15 }
 0x1e3   : > { %v1697_v49 = vsub.f32 %v1441_v25, %v1665_v41  ;;  %v1667_v50 = vmul.f32 %v1997_v28, %v1624_v0  ;;  %v1628_v9 = vmul.f32 0.6931472, %v2285_v53  ;;  %v1727_v37 = vadd.f32 %v1726_v16, %v1696_v12  ;;  %v1286_v15 = vpop.permute.xlu1 %1285 }
 0x1e4   : > { %v2291_v61 = vpop.eup %2290  ;;  %vm1320_vm9 = vcmp.ne.s32.totalorder %v1277_v6, %v2728_v35  ;;  %v1443_v2 = vmul.f32 %v1411_v24, %v2993_v31  ;;  %2300 = vlog2.f32 %v1580_v45  ;;  %v1582_v22 = vsub.f32 1.01, %v2287_v27 }
 0x1e5   : > { %v1698_v46 = vsub.f32 %v1442_v14, %v1666_v20  ;;  %v1668_v1 = vmul.f32 %v3175_v55, %v1626_v62  ;;  %v1630_v7 = vmul.f32 0.6931472, %v2289_v33  ;;  %v1728_v26 = vadd.f32 %v1727_v37, %v1697_v49 }
 0x1e6   : > { %v2293_v54 = vpop.eup %2292  ;;  %v2001_v39 = vsel %vm1319_vm8, 1.0, %v3325_v30  ;;  %vm1321_vm10 = vcmp.ne.s32.totalorder %v1280_v60, %v2724_v34  ;;  %v1444_v28 = vmul.f32 %v1412_v13, %v3007_v56  ;;  %2302 = vlog2.f32 %v1581_v18 }
 0x1e7   : > { %v1699_v31 = vsub.f32 %v1443_v2, %v1667_v50  ;;  %v1669_v24 = vmul.f32 %v3180_v58, %v1628_v9  ;;  %v1632_v48 = vmul.f32 0.6931472, %v2291_v61  ;;  %v1729_v21 = vadd.f32 %v1728_v26, %v1698_v46 }
 0x1e8   : > { %v2295_v23 = vpop.eup %2294  ;;  %v2002_v55 = vsel %vm1320_vm9, 1.0, %v3325_v30  ;;  %vm1322_vm11 = vcmp.ne.s32.totalorder %v1280_v60, %v2728_v35  ;;  %v1445_v47 = vmul.f32 %v1413_v8, %v3020_v43  ;;  %2304 = vlog2.f32 %v1582_v22 }
 0x1e9   : > { %v1700_v57 = vsub.f32 %v1444_v28, %v1668_v1  ;;  %v1670_v56 = vmul.f32 %v3185_v4, %v1630_v7  ;;  %v1634_v13 = vmul.f32 0.6931472, %v2293_v54  ;;  %v1730_v52 = vadd.f32 %v1729_v21, %v1699_v31 }
 0x1ea   : > { %v2297_v29 = vpop.eup %2296  ;;  %v1415_v32 = vsub.f32 1.0, %v2001_v39  ;;  %vm1323_vm12 = vcmp.ne.s32.totalorder %v1283_v63, %v2724_v34  ;;  %v2003_v58 = vsel %vm1321_vm10, 1.0, %v3325_v30  ;;  %v1446_v38 = vmul.f32 %v1414_v17, %v3022_v59 }
 0x1eb   : > { %v1701_v3 = vsub.f32 %v1445_v47, %v1669_v24  ;;  %v1671_v41 = vmul.f32 %v2001_v39, %v1632_v48  ;;  %v1636_v43 = vmul.f32 0.6931472, %v2295_v23  ;;  %v1731_v8 = vadd.f32 %v1730_v52, %v1700_v57 }
 0x1ec   : > { %v2299_v0 = vpop.eup %2298  ;;  %v1416_v36 = vsub.f32 1.0, %v2002_v55  ;;  %vm1324_vm13 = vcmp.ne.s32.totalorder %v1283_v63, %v2728_v35  ;;  %v2004_v4 = vsel %vm1322_vm11, 1.0, %v3325_v30  ;;  %v1447_v53 = vmul.f32 %v1415_v32, %v3057_v11 }
 0x1ed   : > { %v1702_v25 = vsub.f32 %v1446_v38, %v1670_v56  ;;  %v1672_v45 = vmul.f32 %v2002_v55, %v1634_v13  ;;  %v1638_v27 = vmul.f32 0.6931472, %v2297_v29  ;;  %v1732_v6 = vadd.f32 %v1731_v8, %v1701_v3 }
 0x1ee   : > { %v2301_v59 = vpop.eup %2300  ;;  %v2005_v17 = vsel %vm1323_vm12, 1.0, %v3325_v30  ;;  %v1417_v12 = vsub.f32 1.0, %v2003_v58  ;;  %vm1325_vm14 = vcmp.ne.s32.totalorder %v1286_v15, %v2724_v34  ;;  %v1448_v20 = vmul.f32 %v1416_v36, %v3065_v44 }
 0x1ef   : > { %v1703_v62 = vsub.f32 %v1447_v53, %v1671_v41  ;;  %v1673_v16 = vmul.f32 %v2003_v58, %v1636_v43  ;;  %v1640_v33 = vmul.f32 0.6931472, %v2299_v0  ;;  %v1733_v14 = vadd.f32 %v1732_v6, %v1702_v25 }
 0x1f0   : > { %v2303_v18 = vpop.eup %2302  ;;  %v2006_v11 = vsel %vm1324_vm13, 1.0, %v3325_v30  ;;  %v1418_v49 = vsub.f32 1.0, %v2004_v4  ;;  %vm1326_vm15 = vcmp.ne.s32.totalorder %v1286_v15, %v2728_v35  ;;  %v1449_v50 = vmul.f32 %v1417_v12, %v3079_v42 }
 0x1f1   : > { %v1704_v9 = vsub.f32 %v1448_v20, %v1672_v45  ;;  %v1674_v37 = vmul.f32 %v2004_v4, %v1638_v27  ;;  %v1642_v61 = vmul.f32 0.6931472, %v2301_v59  ;;  %v1734_v2 = vadd.f32 %v1733_v14, %v1703_v62 }
 0x1f2   : > { %v2305_v22 = vpop.eup %2304  ;;  %v1419_v44 = vsub.f32 1.0, %v2005_v17  ;;  %v2007_v46 = vsel %vm1325_vm14, 1.0, %v3325_v30  ;;  %v1450_v60 = vmul.f32 %v1418_v49, %v3091_v19  ;;  %v1705_v1 = vsub.f32 %v1449_v50, %v1673_v16 }
 0x1f3   : > { %v1675_v7 = vmul.f32 %v2005_v17, %v1640_v33  ;;  %v1644_v26 = vmul.f32 0.6931472, %v2303_v18  ;;  %v1735_v54 = vadd.f32 %v1734_v2, %v1704_v9  ;;  %v1420_v39 = vsub.f32 1.0, %v2006_v11 }
 0x1f4   : > { %v2008_v35 = vsel %vm1326_vm15, 1.0, %v3325_v30  ;;  %v1451_v42 = vmul.f32 %v1419_v44, %v3104_v40  ;;  %v1706_v28 = vsub.f32 %v1450_v60, %v1674_v37  ;;  %v1676_v63 = vmul.f32 %v2006_v11, %v1642_v61 }
 0x1f5   : > { %v1646_v31 = vmul.f32 0.6931472, %v2305_v22  ;;  %v1736_v24 = vadd.f32 %v1735_v54, %v1705_v1  ;;  %v1421_v48 = vsub.f32 1.0, %v2007_v46  ;;  %v1452_v34 = vmul.f32 %v1420_v39, %v3111_v5 }
 0x1f6   : > { %v1707_v21 = vsub.f32 %v1451_v42, %v1675_v7  ;;  %v1677_v23 = vmul.f32 %v2007_v46, %v1644_v26  ;;  %v1422_v19 = vsub.f32 1.0, %v2008_v35 }
 0x1f7   : > { %v1737_v55 = vadd.f32 %v1736_v24, %v1706_v28  ;;  %v1708_v47 = vsub.f32 %v1452_v34, %v1676_v63  ;;  %v1453_v57 = vmul.f32 %v1421_v48, %v3118_v10  ;;  %v1678_v56 = vmul.f32 %v2008_v35, %v1646_v31 }
 0x1f8   : > { %v1454_v30 = vmul.f32 %v1422_v19, %v3127_v51 }
 0x1f9   : > { %v1738_v13 = vadd.f32 %v1737_v55, %v1707_v21  ;;  %v1709_v40 = vsub.f32 %v1453_v57, %v1677_v23 }
 0x1fa   : > { %v1710_v29 = vsub.f32 %v1454_v30, %v1678_v56 }
 0x1fb   : > { %v1739_v52 = vadd.f32 %v1738_v13, %v1708_v47 }
 0x1fd   : > { %v1740_v32 = vadd.f32 %v1739_v52, %v1709_v40 }
 0x1ff   : > { %v1741_v58 = vadd.f32 %v1740_v32, %v1710_v29 }
 0x201   : > { %1748 = vadd.xlane.f32.xlu0 %v1741_v58 }
 0x28e   : > { %v1749_v38 = vpop.xlane.xlu0 %1748 }
 0x28f   : > { %v1750_v5 = vrot.slane %v1749_v38, 4 }
 0x291   : > { %v1751_v15 = vadd.f32 %v1750_v5, %v1749_v38 }
 0x293   : > { %v1752_v3 = vrot.slane %v1751_v15, 2 }
 0x295   : > { %v1753_v41 = vadd.f32 %v1752_v3, %v1751_v15 }
 0x297   : > { %v1754_v43 = vrot.slane %v1753_v41, 1 }
 0x299   : > { %v1755_v10 = vadd.f32 %v1754_v43, %v1753_v41 }
 0x29b   : > { %2045 = vpush %v1755_v10 }
 0x2cc   : > { %s2046_s18 = spop %2045 }
 0x2cd   : > { %v1757_v51 = vstv %s2046_s18 }
 0x2ce   : > { %v1758_v8 = vmul.f32 1.5258789e-05, %v1757_v51 }
 0x2d0   : > { %1759 = vst [vmem:[%s365_s28] sm:$0x1] %v1758_v8 }
 0x2d1   : > { %2319 = shalt.err (!%p2316_p5)
}
 0x2d2   : > { %s2320_s17 = scalar_lea.hbm %s3252_s20, 16  ;;  %s2324_s14 = scalar_lea.hbm %s3305_s6, 32 }
 0x2d3   : > { %p2321_p6 = scmp.ne.s32.totalorder %s3252_s20, %s2320_s17  ;;  %p2325_p10 = scmp.lt.u32.totalorder %s3252_s20, %s3305_s6 }
 0x2d4   : > { %p2326_p11 = scmp.lt.u32.totalorder %s2324_s14, %s2320_s17  ;;  %p2328_p13 = scmp.lt.u32.totalorder %s2320_s17, %s3252_s20 }
 0x2d5   : > { %p2322_p7 = pnand %p2321_p6, %p2464_p4 }
 0x2d6   : > { %p2327_p12 = por %p2326_p11, %p2325_p10 }
 0x2d7   : > { %p2323_p9 = pneg %p2322_p7 }
 0x2d8   : > { %p2329_p0 = por %p2328_p13, %p2327_p12 }
 0x2da   : > { %p2330_p1 = pnand %p2329_p0, %p2323_p9 }
 0x2dc   : > { %2333 = shalt.err (!%p2330_p1)
}
 0x2dd   : > { %2047 = dma.vmem_to_hbm [thread:$0]  (%p2464_p4), %s3254_s16, 16, %s3252_s20, %s1761_s27  }
 0x2de PF: > { %p2053_p2 = scmp.ge.s32.totalorder %s2384_s26, 2  ;;  %s1785_s19 = sand.u32 1, %s2364_s21  }
 0x2df   : > { %s1786_s30 = scalar_lea.sflag [#allocation5], %s1785_s19 }
 0x2e0   : > { %p2050_p3 = pnand %p2053_p2, %p2471_p8 }
 0x2e2   : > { %2359 = dma.done.wait (!%p2050_p3), %s1786_s30, 16  }
 0x2e3   : > { %2361 = vsyncadd (!%p2050_p3), %s1786_s30, 4294967280  ;;  %s19_s26 = sadd.s32 1, %s2384_s26   ;;  %s3346_s21 = smov %s2368_s22 }
 0x2e4   : > { %p16_p5 = scmp.ge.s32.totalorder %s19_s26, 4   ;;  %s3347_s22 = smov %s2372_s23 }
 0x2e5   : > { %s3348_s23 = smov %s2477_s10  ;;  %s3349_s24 = smov %s2380_s25 }
 0x2e6   : > { %s3350_s25 = smov %s3352_s29  ;;  %18 = sbr.rel (!%p16_p5) target bundleno = 4 (0x4), region = 110 }
 0x2ed   :  { %1790 = vsyncpa [#allocation5], 1 }
 0x2ee   :  { %1792 = vsyncpa [#allocation5 + $0x1], 1 }

</bundles_post_ra>
